<compile_context>
chip_gen: v7x
topology: tpu7x:2x2x1
jax: 0.10.0
libtpu: 0.0.40
codegen_flags: <defaults>
</compile_context>

<pallas_src>
import math
import functools

import jax
import jax.numpy as jnp
from jax.experimental import pallas as pl
from jax.experimental.pallas import tpu as pltpu

HEAD_PAD = 8  # mean|std head rows padded to a full sublane group


def _softplus(x):
    # Matches F.softplus(x) with beta=1, threshold=20.
    safe = jnp.where(x > 20.0, 0.0, x)
    return jnp.where(x > 20.0, x, jnp.log1p(jnp.exp(safe)))


def actor_kernel(x_ref, eps_ref,
                 w1_ref, b1_ref, w2_ref, b2_ref, w3_ref, b3_ref,
                 wh_ref, bh_ref,
                 out_ref):
    A = eps_ref.shape[0]  # action_dim (== 2, as hard-coded in the reference)

    # ---- MLP trunk, feature-major: (out, in) @ (in, TB) -> (out, TB). ----
    x = x_ref[...].astype(jnp.bfloat16)                           # (S, TB)
    h = jnp.dot(w1_ref[...], x,
                preferred_element_type=jnp.float32) + b1_ref[...]  # (512, TB)
    h = jnp.maximum(h.astype(jnp.bfloat16), 0)                     # bf16 relu
    h = jnp.dot(w2_ref[...], h,
                preferred_element_type=jnp.float32) + b2_ref[...]  # (256, TB)
    h = jnp.maximum(h.astype(jnp.bfloat16), 0)
    h = jnp.dot(w3_ref[...], h,
                preferred_element_type=jnp.float32) + b3_ref[...]  # (64, TB)
    h = jnp.maximum(h.astype(jnp.bfloat16), 0)

    # ---- Fused (padded) mean|std head: (8, 64) @ (64, TB) -> (8, TB). ----
    head = jnp.dot(wh_ref[...], h,
                   preferred_element_type=jnp.float32) + bh_ref[...]
    m0 = head[0:1, :]             # mean, action column 0   (1, TB)
    m1 = head[1:2, :]             # mean, action column 1   (1, TB)
    std = _softplus(head[A:2 * A, :])                        # (A, TB)

    # Normal(mean, std).log_prob(mean + std*eps) == -0.5*eps^2 - log(std)
    # - 0.5*log(2*pi)  (no divide, no 0/0 hazard when std underflows).
    eps = eps_ref[...]                                        # (A, TB)
    log_prob = (-0.5 * eps * eps - jnp.log(std)
                - 0.5 * jnp.log(2.0 * jnp.pi))                # (A, TB)

    # action[0] = tanh(mean[0]);  action[1] = sigmoid(mean[1])
    # (static row slices -> exactly the needed transcendentals, no selects).
    t0 = jnp.tanh(m0)
    s1 = jax.nn.sigmoid(m1)

    # log_prob -= log(1 - tanh(action)^2 + 1e-7)  (tanh of the already
    # squashed action, exactly as in the PyTorch reference).
    corr0 = jnp.log(1.0 - jnp.tanh(t0) ** 2 + 1e-7)
    corr1 = jnp.log(1.0 - jnp.tanh(s1) ** 2 + 1e-7)
    lp0 = log_prob[0:1, :] - corr0
    lp1 = log_prob[1:2, :] - corr1

    # Lane-dense row writes: rows [0:A) action, rows [A:2A) clamped log_prob.
    out_ref[0:1, :] = t0 * 2.5
    out_ref[1:2, :] = s1 * 0.22
    out_ref[2:3, :] = jnp.clip(lp0, -20.0, 2.0)
    out_ref[3:4, :] = jnp.clip(lp1, -20.0, 2.0)


def _choose_tiling(B):
    """Return (batch_tile, padded_batch).

    Multiples of 128 with >=2 grid steps whenever possible (v7x megacore),
    capped at 1024 (VMEM-safe on v5e).  Small batches run as a single grid
    step over the sublane-padded full batch.
    """
    if B >= 256:
        tb = min(1024, max(128, ((B // 2) // 128) * 128))
    else:
        tb = max(8, ((B + 7) // 8) * 8)
    padded = ((B + tb - 1) // tb) * tb
    return tb, padded


def actor_net_forward(x, eps, params):
    """x: (B, state_dim) f32;  eps: (B, action_dim) f32 standard-normal noise
    (the reparameterized Normal.rsample noise).  Returns (action, log_std),
    each (B, action_dim) f32, matching Actor_net.forward semantics."""
    B, state_dim = x.shape
    A = eps.shape[1]
    assert A == 2, "reference Actor_Linear hard-codes a 2-column action"

    TB, Bp = _choose_tiling(B)
    grid = (Bp // TB,)

    # Batch-on-lanes layout for the pipelined operands.
    x_t = jnp.transpose(x)        # (S, B)
    eps_t = jnp.transpose(eps)    # (A, B)
    if Bp != B:
        x_t = jnp.pad(x_t, ((0, 0), (0, Bp - B)))
        eps_t = jnp.pad(eps_t, ((0, 0), (0, Bp - B)))

    x_spec = pl.BlockSpec((state_dim, TB), lambda i: (0, i))
    eps_spec = pl.BlockSpec((A, TB), lambda i: (0, i))
    out_spec = pl.BlockSpec((2 * A, TB), lambda i: (0, i))

    # Weights/biases: constant index map -> fetched once, VMEM-resident.
    def resident(arr):
        return pl.BlockSpec(arr.shape, lambda i: (0, 0))

    weight_args = (params["w1"], params["b1"],
                   params["w2"], params["b2"],
                   params["w3"], params["b3"],
                   params["wh"], params["bh"])

    out = pl.pallas_call(
        actor_kernel,
        out_shape=jax.ShapeDtypeStruct((2 * A, Bp), jnp.float32),
        grid=grid,
        in_specs=[x_spec, eps_spec] + [resident(a) for a in weight_args],
        out_specs=out_spec,
        compiler_params=pltpu.CompilerParams(
            dimension_semantics=("parallel",)),
    )(x_t, eps_t, *weight_args)

    action = out[:A, :B].T
    log_std = out[A:2 * A, :B].T
    return action, log_std


def xavier_uniform(key, fan_in, fan_out):
    bound = math.sqrt(6.0 / (fan_in + fan_out))
    # Stored in PyTorch-native (out, in) layout.
    return jax.random.uniform(key, (fan_out, fan_in), jnp.float32, -bound, bound)


def init_params(key, state_dim, action_dim):
    """Xavier-uniform weights, zero biases (weights_init_), kernel-ready:
    bf16 (out, in) weights, fused+padded mean|std head, (out, 1) f32 biases."""
    assert action_dim == 2
    ks = jax.random.split(key, 5)
    w1 = xavier_uniform(ks[0], state_dim, 512)
    w2 = xavier_uniform(ks[1], 512, 256)
    w3 = xavier_uniform(ks[2], 256, 64)
    wm = xavier_uniform(ks[3], 64, action_dim)   # mean head
    ws = xavier_uniform(ks[4], 64, action_dim)   # std head
    pad_rows = HEAD_PAD - 2 * action_dim
    wh = jnp.concatenate([wm, ws, jnp.zeros((pad_rows, 64), jnp.float32)], axis=0)

    return {
        "w1": w1.astype(jnp.bfloat16), "b1": jnp.zeros((512, 1), jnp.float32),
        "w2": w2.astype(jnp.bfloat16), "b2": jnp.zeros((256, 1), jnp.float32),
        "w3": w3.astype(jnp.bfloat16), "b3": jnp.zeros((64, 1), jnp.float32),
        "wh": wh.astype(jnp.bfloat16), "bh": jnp.zeros((HEAD_PAD, 1), jnp.float32),
    }


if __name__ == "__main__":
    key = jax.random.PRNGKey(0)
    k_param, k_x, k_eps = jax.random.split(key, 3)

    B, state_dim, action_dim = 8, 32, 2
    params = init_params(k_param, state_dim, action_dim)
    x = jax.random.normal(k_x, (B, state_dim), jnp.float32)
    eps = jax.random.normal(k_eps, (B, action_dim), jnp.float32)  # rsample noise

    fwd = jax.jit(functools.partial(actor_net_forward, params=params))
    action, log_std = fwd(x, eps)
    jax.block_until_ready((action, log_std))

    assert action.shape == (B, action_dim) and log_std.shape == (B, action_dim)
    assert bool(jnp.all(jnp.isfinite(action))) and bool(jnp.all(jnp.isfinite(log_std)))
    # log_std must respect the clamp from Actor_net.forward
    assert bool(jnp.all(log_std >= -20.0)) and bool(jnp.all(log_std <= 2.0))
    # action ranges implied by tanh*2.5 / sigmoid*0.22 squashing
    assert bool(jnp.all(jnp.abs(action[:, 0]) <= 2.5))
    assert bool(jnp.all(action[:, 1] >= 0.0)) and bool(jnp.all(action[:, 1] <= 0.22))
    print("KERNEL_OK")
</pallas_src>

<mosaic_0001>
module attributes {stable_mosaic.version = 11 : i64} {
  func.func @actor_kernel(%arg0: i32, %arg1: memref<32x8xf32, #tpu.memory_space<vmem>>, %arg2: memref<2x8xf32, #tpu.memory_space<vmem>>, %arg3: memref<512x32xbf16, #tpu.memory_space<vmem>>, %arg4: memref<512x1xf32, #tpu.memory_space<vmem>>, %arg5: memref<256x512xbf16, #tpu.memory_space<vmem>>, %arg6: memref<256x1xf32, #tpu.memory_space<vmem>>, %arg7: memref<64x256xbf16, #tpu.memory_space<vmem>>, %arg8: memref<64x1xf32, #tpu.memory_space<vmem>>, %arg9: memref<8x64xbf16, #tpu.memory_space<vmem>>, %arg10: memref<8x1xf32, #tpu.memory_space<vmem>>, %arg11: memref<4x8xf32, #tpu.memory_space<vmem>>) attributes {dimension_semantics = [#tpu.dimension_semantics<parallel>], iteration_bounds = array<i64: 1>, scalar_prefetch = 0 : i64, scratch_operands = 0 : i64, tpu.core_type = #tpu.core_type<tc>, window_params = [{transform_indices = @transform_0, window_bounds = array<i64: 32, 8>}, {transform_indices = @transform_1, window_bounds = array<i64: 2, 8>}, {pipeline_mode = #tpu.pipeline_mode<synchronous>, transform_indices = @transform_2, window_bounds = array<i64: 512, 32>}, {pipeline_mode = #tpu.pipeline_mode<synchronous>, transform_indices = @transform_3, window_bounds = array<i64: 512, 1>}, {pipeline_mode = #tpu.pipeline_mode<synchronous>, transform_indices = @transform_4, window_bounds = array<i64: 256, 512>}, {pipeline_mode = #tpu.pipeline_mode<synchronous>, transform_indices = @transform_5, window_bounds = array<i64: 256, 1>}, {pipeline_mode = #tpu.pipeline_mode<synchronous>, transform_indices = @transform_6, window_bounds = array<i64: 64, 256>}, {pipeline_mode = #tpu.pipeline_mode<synchronous>, transform_indices = @transform_7, window_bounds = array<i64: 64, 1>}, {pipeline_mode = #tpu.pipeline_mode<synchronous>, transform_indices = @transform_8, window_bounds = array<i64: 8, 64>}, {pipeline_mode = #tpu.pipeline_mode<synchronous>, transform_indices = @transform_9, window_bounds = array<i64: 8, 1>}, {transform_indices = @transform_10, window_bounds = array<i64: 4, 8>}]} {
    %c0 = arith.constant 0 : index
    %c0_0 = arith.constant 0 : index
    %0 = vector.load %arg1[%c0, %c0_0] : memref<32x8xf32, #tpu.memory_space<vmem>>, vector<32x8xf32>
    %1 = arith.truncf %0 : vector<32x8xf32> to vector<32x8xbf16>
    %c0_1 = arith.constant 0 : index
    %c0_2 = arith.constant 0 : index
    %2 = vector.load %arg3[%c0_1, %c0_2] : memref<512x32xbf16, #tpu.memory_space<vmem>>, vector<512x32xbf16>
    %cst = arith.constant dense<0.000000e+00> : vector<512x8xf32>
    %3 = tpu.matmul %2, %1, %cst {dimension_numbers = #tpu.dot_dimension_numbers<[1], [0], [0], [1], [0, 0, 1, 1], [], []>} : vector<512x32xbf16>, vector<32x8xbf16>, vector<512x8xf32> -> vector<512x8xf32>
    %c0_3 = arith.constant 0 : index
    %c0_4 = arith.constant 0 : index
    %4 = vector.load %arg4[%c0_3, %c0_4] : memref<512x1xf32, #tpu.memory_space<vmem>>, vector<512x1xf32>
    %5 = vector.broadcast %4 : vector<512x1xf32> to vector<512x8xf32>
    %6 = arith.addf %3, %5 : vector<512x8xf32>
    %7 = arith.truncf %6 : vector<512x8xf32> to vector<512x8xbf16>
    %cst_5 = arith.constant 0.000000e+00 : bf16
    %8 = vector.broadcast %cst_5 : bf16 to vector<512x8xbf16>
    %9 = arith.maximumf %7, %8 : vector<512x8xbf16>
    %c0_6 = arith.constant 0 : index
    %c0_7 = arith.constant 0 : index
    %10 = vector.load %arg5[%c0_6, %c0_7] : memref<256x512xbf16, #tpu.memory_space<vmem>>, vector<256x512xbf16>
    %cst_8 = arith.constant dense<0.000000e+00> : vector<256x8xf32>
    %11 = tpu.matmul %10, %9, %cst_8 {dimension_numbers = #tpu.dot_dimension_numbers<[1], [0], [0], [1], [0, 0, 1, 1], [], []>} : vector<256x512xbf16>, vector<512x8xbf16>, vector<256x8xf32> -> vector<256x8xf32>
    %c0_9 = arith.constant 0 : index
    %c0_10 = arith.constant 0 : index
    %12 = vector.load %arg6[%c0_9, %c0_10] : memref<256x1xf32, #tpu.memory_space<vmem>>, vector<256x1xf32>
    %13 = vector.broadcast %12 : vector<256x1xf32> to vector<256x8xf32>
    %14 = arith.addf %11, %13 : vector<256x8xf32>
    %15 = arith.truncf %14 : vector<256x8xf32> to vector<256x8xbf16>
    %cst_11 = arith.constant 0.000000e+00 : bf16
    %16 = vector.broadcast %cst_11 : bf16 to vector<256x8xbf16>
    %17 = arith.maximumf %15, %16 : vector<256x8xbf16>
    %c0_12 = arith.constant 0 : index
    %c0_13 = arith.constant 0 : index
    %18 = vector.load %arg7[%c0_12, %c0_13] : memref<64x256xbf16, #tpu.memory_space<vmem>>, vector<64x256xbf16>
    %cst_14 = arith.constant dense<0.000000e+00> : vector<64x8xf32>
    %19 = tpu.matmul %18, %17, %cst_14 {dimension_numbers = #tpu.dot_dimension_numbers<[1], [0], [0], [1], [0, 0, 1, 1], [], []>} : vector<64x256xbf16>, vector<256x8xbf16>, vector<64x8xf32> -> vector<64x8xf32>
    %c0_15 = arith.constant 0 : index
    %c0_16 = arith.constant 0 : index
    %20 = vector.load %arg8[%c0_15, %c0_16] : memref<64x1xf32, #tpu.memory_space<vmem>>, vector<64x1xf32>
    %21 = vector.broadcast %20 : vector<64x1xf32> to vector<64x8xf32>
    %22 = arith.addf %19, %21 : vector<64x8xf32>
    %23 = arith.truncf %22 : vector<64x8xf32> to vector<64x8xbf16>
    %cst_17 = arith.constant 0.000000e+00 : bf16
    %24 = vector.broadcast %cst_17 : bf16 to vector<64x8xbf16>
    %25 = arith.maximumf %23, %24 : vector<64x8xbf16>
    %c0_18 = arith.constant 0 : index
    %c0_19 = arith.constant 0 : index
    %26 = vector.load %arg9[%c0_18, %c0_19] : memref<8x64xbf16, #tpu.memory_space<vmem>>, vector<8x64xbf16>
    %cst_20 = arith.constant dense<0.000000e+00> : vector<8x8xf32>
    %27 = tpu.matmul %26, %25, %cst_20 {dimension_numbers = #tpu.dot_dimension_numbers<[1], [0], [0], [1], [0, 0, 1, 1], [], []>} : vector<8x64xbf16>, vector<64x8xbf16>, vector<8x8xf32> -> vector<8x8xf32>
    %c0_21 = arith.constant 0 : index
    %c0_22 = arith.constant 0 : index
    %28 = vector.load %arg10[%c0_21, %c0_22] : memref<8x1xf32, #tpu.memory_space<vmem>>, vector<8x1xf32>
    %29 = vector.broadcast %28 : vector<8x1xf32> to vector<8x8xf32>
    %30 = arith.addf %27, %29 : vector<8x8xf32>
    %31 = vector.extract_strided_slice %30 {offsets = [0, 0], sizes = [1, 8], strides = [1, 1]} : vector<8x8xf32> to vector<1x8xf32>
    %32 = vector.extract_strided_slice %30 {offsets = [1, 0], sizes = [1, 8], strides = [1, 1]} : vector<8x8xf32> to vector<1x8xf32>
    %33 = vector.extract_strided_slice %30 {offsets = [2, 0], sizes = [2, 8], strides = [1, 1]} : vector<8x8xf32> to vector<2x8xf32>
    %cst_23 = arith.constant 2.000000e+01 : f32
    %34 = vector.broadcast %cst_23 : f32 to vector<2x8xf32>
    %35 = arith.cmpf ogt, %33, %34 : vector<2x8xf32>
    %cst_24 = arith.constant 0.000000e+00 : f32
    %36 = vector.broadcast %cst_24 : f32 to vector<2x8xf32>
    %37 = arith.select %35, %36, %33 : vector<2x8xi1>, vector<2x8xf32>
    %cst_25 = arith.constant 2.000000e+01 : f32
    %38 = vector.broadcast %cst_25 : f32 to vector<2x8xf32>
    %39 = arith.cmpf ogt, %33, %38 : vector<2x8xf32>
    %40 = math.exp %37 : vector<2x8xf32>
    %41 = math.log1p %40 : vector<2x8xf32>
    %42 = arith.select %39, %33, %41 : vector<2x8xi1>, vector<2x8xf32>
    %c0_26 = arith.constant 0 : index
    %c0_27 = arith.constant 0 : index
    %43 = vector.load %arg2[%c0_26, %c0_27] : memref<2x8xf32, #tpu.memory_space<vmem>>, vector<2x8xf32>
    %cst_28 = arith.constant -5.000000e-01 : f32
    %44 = vector.broadcast %cst_28 : f32 to vector<2x8xf32>
    %45 = arith.mulf %44, %43 : vector<2x8xf32>
    %46 = arith.mulf %45, %43 : vector<2x8xf32>
    %47 = math.log %42 : vector<2x8xf32>
    %48 = arith.subf %46, %47 : vector<2x8xf32>
    %cst_29 = arith.constant 6.28318548 : f32
    %49 = math.log %cst_29 : f32
    %cst_30 = arith.constant 5.000000e-01 : f32
    %50 = arith.mulf %cst_30, %49 : f32
    %51 = vector.broadcast %50 : f32 to vector<2x8xf32>
    %52 = arith.subf %48, %51 : vector<2x8xf32>
    %53 = math.tanh %31 : vector<1x8xf32>
    %54 = arith.negf %32 : vector<1x8xf32>
    %55 = math.exp %54 : vector<1x8xf32>
    %cst_31 = arith.constant 1.000000e+00 : f32
    %56 = vector.broadcast %cst_31 : f32 to vector<1x8xf32>
    %57 = arith.addf %56, %55 : vector<1x8xf32>
    %58 = arith.divf %56, %57 : vector<1x8xf32>
    %59 = math.tanh %53 : vector<1x8xf32>
    %60 = arith.mulf %59, %59 : vector<1x8xf32>
    %cst_32 = arith.constant 1.000000e+00 : f32
    %61 = vector.broadcast %cst_32 : f32 to vector<1x8xf32>
    %62 = arith.subf %61, %60 : vector<1x8xf32>
    %cst_33 = arith.constant 1.000000e-07 : f32
    %63 = vector.broadcast %cst_33 : f32 to vector<1x8xf32>
    %64 = arith.addf %62, %63 : vector<1x8xf32>
    %65 = math.log %64 : vector<1x8xf32>
    %66 = math.tanh %58 : vector<1x8xf32>
    %67 = arith.mulf %66, %66 : vector<1x8xf32>
    %cst_34 = arith.constant 1.000000e+00 : f32
    %68 = vector.broadcast %cst_34 : f32 to vector<1x8xf32>
    %69 = arith.subf %68, %67 : vector<1x8xf32>
    %cst_35 = arith.constant 1.000000e-07 : f32
    %70 = vector.broadcast %cst_35 : f32 to vector<1x8xf32>
    %71 = arith.addf %69, %70 : vector<1x8xf32>
    %72 = math.log %71 : vector<1x8xf32>
    %73 = vector.extract_strided_slice %52 {offsets = [0, 0], sizes = [1, 8], strides = [1, 1]} : vector<2x8xf32> to vector<1x8xf32>
    %74 = arith.subf %73, %65 : vector<1x8xf32>
    %75 = vector.extract_strided_slice %52 {offsets = [1, 0], sizes = [1, 8], strides = [1, 1]} : vector<2x8xf32> to vector<1x8xf32>
    %76 = arith.subf %75, %72 : vector<1x8xf32>
    %cst_36 = arith.constant 2.500000e+00 : f32
    %77 = vector.broadcast %cst_36 : f32 to vector<1x8xf32>
    %78 = arith.mulf %53, %77 : vector<1x8xf32>
    %c0_37 = arith.constant 0 : index
    %c0_38 = arith.constant 0 : index
    %79 = vector.load %arg11[%c0_37, %c0_38] : memref<4x8xf32, #tpu.memory_space<vmem>>, vector<1x8xf32>
    tpu.vector_store %arg11[%c0_37, %c0_38], %78 {strides = array<i32>} : memref<4x8xf32, #tpu.memory_space<vmem>>, vector<1x8xf32>,
    %cst_39 = arith.constant 2.200000e-01 : f32
    %80 = vector.broadcast %cst_39 : f32 to vector<1x8xf32>
    %81 = arith.mulf %58, %80 : vector<1x8xf32>
    %c1 = arith.constant 1 : index
    %c0_40 = arith.constant 0 : index
    %82 = vector.load %arg11[%c1, %c0_40] : memref<4x8xf32, #tpu.memory_space<vmem>>, vector<1x8xf32>
    tpu.vector_store %arg11[%c1, %c0_40], %81 {strides = array<i32>} : memref<4x8xf32, #tpu.memory_space<vmem>>, vector<1x8xf32>,
    %cst_41 = arith.constant -2.000000e+01 : f32
    %cst_42 = arith.constant 2.000000e+00 : f32
    %83 = vector.broadcast %cst_41 : f32 to vector<1x8xf32>
    %84 = arith.maximumf %83, %74 : vector<1x8xf32>
    %85 = vector.broadcast %cst_42 : f32 to vector<1x8xf32>
    %86 = arith.minimumf %85, %84 : vector<1x8xf32>
    %c2 = arith.constant 2 : index
    %c0_43 = arith.constant 0 : index
    %87 = vector.load %arg11[%c2, %c0_43] : memref<4x8xf32, #tpu.memory_space<vmem>>, vector<1x8xf32>
    tpu.vector_store %arg11[%c2, %c0_43], %86 {strides = array<i32>} : memref<4x8xf32, #tpu.memory_space<vmem>>, vector<1x8xf32>,
    %cst_44 = arith.constant -2.000000e+01 : f32
    %cst_45 = arith.constant 2.000000e+00 : f32
    %88 = vector.broadcast %cst_44 : f32 to vector<1x8xf32>
    %89 = arith.maximumf %88, %76 : vector<1x8xf32>
    %90 = vector.broadcast %cst_45 : f32 to vector<1x8xf32>
    %91 = arith.minimumf %90, %89 : vector<1x8xf32>
    %c3 = arith.constant 3 : index
    %c0_46 = arith.constant 0 : index
    %92 = vector.load %arg11[%c3, %c0_46] : memref<4x8xf32, #tpu.memory_space<vmem>>, vector<1x8xf32>
    tpu.vector_store %arg11[%c3, %c0_46], %91 {strides = array<i32>} : memref<4x8xf32, #tpu.memory_space<vmem>>, vector<1x8xf32>,
    return
  }
  func.func @transform_0(%arg0: i32) -> (i32, i32) {
    %c0_i32 = arith.constant 0 : i32
    %c0_i32_0 = arith.constant 0 : i32
    return %c0_i32, %arg0 : i32, i32
  }
  func.func @transform_1(%arg0: i32) -> (i32, i32) {
    %c0_i32 = arith.constant 0 : i32
    %c0_i32_0 = arith.constant 0 : i32
    return %c0_i32, %arg0 : i32, i32
  }
  func.func @transform_2(%arg0: i32) -> (i32, i32) {
    %c0_i32 = arith.constant 0 : i32
    %c0_i32_0 = arith.constant 0 : i32
    %c0_i32_1 = arith.constant 0 : i32
    return %c0_i32, %c0_i32_0 : i32, i32
  }
  func.func @transform_3(%arg0: i32) -> (i32, i32) {
    %c0_i32 = arith.constant 0 : i32
    %c0_i32_0 = arith.constant 0 : i32
    %c0_i32_1 = arith.constant 0 : i32
    return %c0_i32, %c0_i32_0 : i32, i32
  }
  func.func @transform_4(%arg0: i32) -> (i32, i32) {
    %c0_i32 = arith.constant 0 : i32
    %c0_i32_0 = arith.constant 0 : i32
    %c0_i32_1 = arith.constant 0 : i32
    return %c0_i32, %c0_i32_0 : i32, i32
  }
  func.func @transform_5(%arg0: i32) -> (i32, i32) {
    %c0_i32 = arith.constant 0 : i32
    %c0_i32_0 = arith.constant 0 : i32
    %c0_i32_1 = arith.constant 0 : i32
    return %c0_i32, %c0_i32_0 : i32, i32
  }
  func.func @transform_6(%arg0: i32) -> (i32, i32) {
    %c0_i32 = arith.constant 0 : i32
    %c0_i32_0 = arith.constant 0 : i32
    %c0_i32_1 = arith.constant 0 : i32
    return %c0_i32, %c0_i32_0 : i32, i32
  }
  func.func @transform_7(%arg0: i32) -> (i32, i32) {
    %c0_i32 = arith.constant 0 : i32
    %c0_i32_0 = arith.constant 0 : i32
    %c0_i32_1 = arith.constant 0 : i32
    return %c0_i32, %c0_i32_0 : i32, i32
  }
  func.func @transform_8(%arg0: i32) -> (i32, i32) {
    %c0_i32 = arith.constant 0 : i32
    %c0_i32_0 = arith.constant 0 : i32
    %c0_i32_1 = arith.constant 0 : i32
    return %c0_i32, %c0_i32_0 : i32, i32
  }
  func.func @transform_9(%arg0: i32) -> (i32, i32) {
    %c0_i32 = arith.constant 0 : i32
    %c0_i32_0 = arith.constant 0 : i32
    %c0_i32_1 = arith.constant 0 : i32
    return %c0_i32, %c0_i32_0 : i32, i32
  }
  func.func @transform_10(%arg0: i32) -> (i32, i32) {
    %c0_i32 = arith.constant 0 : i32
    %c0_i32_0 = arith.constant 0 : i32
    return %c0_i32, %arg0 : i32, i32
  }
}

</mosaic_0001>

<bundles_post_ra>
// kernel: actor_net_forward.1
= control target key start
LH: loop header
LB: loop body
LE: loop exit
PB: predicated region body
PF: predicated region fallthrough
CT: control target
= control target key end

     0   :  { %v4354_v0 = vmov 0   ;;  %vm650_vm0 = vcmask 261120   ;;  %vm3004_vm1 = vmmov 0   ;;  %vm2206_vm2 = vcmask 523264   ;;  %s4343_s3 = inlined_call_operand.vmem [shape: f32[512,1], index: 3, kind: input, shape index: {}]   ;;  %s4344_s0 = inlined_call_operand.vmem [shape: f32[32,8], index: 0, kind: input, shape index: {}]   ;;  %s4345_s2 = inlined_call_operand.vmem [shape: bf16[512,32], index: 2, kind: input, shape index: {}]   ;;  %s4346_s5 = inlined_call_operand.vmem [shape: f32[256,1], index: 5, kind: input, shape index: {}]   ;;  %s4347_s4 = inlined_call_operand.vmem [shape: bf16[256,512], index: 4, kind: input, shape index: {}]   ;;  %s4348_s7 = inlined_call_operand.vmem [shape: f32[64,1], index: 7, kind: input, shape index: {}]   ;;  %s4349_s9 = inlined_call_operand.vmem [shape: f32[8,1], index: 9, kind: input, shape index: {}]   ;;  %s4350_s6 = inlined_call_operand.vmem [shape: bf16[64,256], index: 6, kind: input, shape index: {}]   ;;  %s4351_s8 = inlined_call_operand.vmem [shape: bf16[8,64], index: 8, kind: input, shape index: {}]   ;;  %s4352_s10 = inlined_call_operand.vmem [shape: f32[4,8], index: 10, kind: output, shape index: {}]   ;;  %s4353_s1 = inlined_call_operand.vmem [shape: f32[2,8], index: 1, kind: input, shape index: {}]  }
   0x1   :  { %2841 = vset.pattern.permute.xlu1 %v4354_v0  ;;  %2840 = vset.pattern.permute.xlu0 %v4354_v0  ;;  %v122_v1 = vld [vmem:[%s4343_s3 + $0x80] sm:$0xff]  ;;  %v37_v4 = vld [vmem:[%s4344_s0 + $0x8] sm:$0xff]  ;;  %v38_v7 = vld [vmem:[%s4344_s0 + $0x10] sm:$0xff]  ;;  %vm2296_vm4 = vcmask 57344   ;;  %vm2299_vm5 = vcmask 58369  }
   0x2   :  { %v106_v2 = vld [vmem:[%s4343_s3] sm:$0xff]  ;;  %252 = vperm.xlu0 %2840, %v122_v1   ;;  %v123_v6 = vld [vmem:[%s4343_s3 + $0x88] sm:$0xff]  ;;  %v39_v8 = vld [vmem:[%s4344_s0 + $0x18] sm:$0xff] }
   0x3   :  { %v36_v3 = vld [vmem:[%s4344_s0] sm:$0xff]  ;;  %172 = vperm.xlu1 %2841, %v106_v2   ;;  %v107_v9 = vld [vmem:[%s4343_s3 + $0x8] sm:$0xff]  ;;  %v41_v10 = vpack.c.bf16 %v39_v8, %v38_v7  ;;  %v2843_v12 = vld [vmem:[%s4345_s2 + $0xb0] sm:$0xff]  }
   0x4   :  { %v40_v5 = vpack.c.bf16 %v37_v4, %v36_v3  ;;  %v2842_v11 = vld [vmem:[%s4345_s2] sm:$0xff]   ;;  %v155_v14 = vld [vmem:[%s4343_s3 + $0x188] sm:$0xff]  ;;  %2801 = vmatprep.mubr.msk.bf16.mxu1 %vm650_vm0, %v2843_v12  ;;  %v2845_v16 = vld [vmem:[%s4345_s2 + $0xb8] sm:$0xff]  }
   0x5   :  { %v154_v13 = vld [vmem:[%s4343_s3 + $0x180] sm:$0xff]  ;;  %2757 = vmatprep.mubr.msk.bf16.mxu0 %vm650_vm0, %v2842_v11  ;;  %v2844_v15 = vld [vmem:[%s4345_s2 + $0x8] sm:$0xff]   ;;  %v2846_v18 = vld [vmem:[%s4345_s2 + $0x10] sm:$0xff]  }
   0x6   :  { %2753 = vmatprep.subr.bf16.mxu0 %v40_v5  ;;  %2833 = vmatprep.subr.bf16.mxu1 %v40_v5  ;;  %v138_v17 = vld [vmem:[%s4343_s3 + $0x100] sm:$0xff]  ;;  %v139_v20 = vld [vmem:[%s4343_s3 + $0x108] sm:$0xff]  ;;  %v124_v21 = vld [vmem:[%s4343_s3 + $0x90] sm:$0xff] }
   0x7   :  { %2754 = vmatpush3.bf16.msra.mxu0 %v40_v5  ;;  %2835 = vmatpush3.bf16.msra.mxu1 %v40_v5  ;;  %v2847_v19 = vld [vmem:[%s4345_s2 + $0xc0] sm:$0xff]   ;;  %v125_v22 = vld [vmem:[%s4343_s3 + $0x98] sm:$0xff]  ;;  %v2849_v24 = vld [vmem:[%s4345_s2 + $0xc8] sm:$0xff]  }
   0x8   :  { %257 = vperm.xlu0 %2840, %v123_v6   ;;  %177 = vperm.xlu1 %2841, %v107_v9   ;;  %v2848_v23 = vld [vmem:[%s4345_s2 + $0x18] sm:$0xff]   ;;  %v2850_v25 = vld [vmem:[%s4345_s2 + $0x20] sm:$0xff]   ;;  %v2851_v26 = vld [vmem:[%s4345_s2 + $0xd0] sm:$0xff]  }
   0x9   :  { %2755 = vmatprep.subr.bf16.mxu0 %v41_v10  ;;  %2834 = vmatprep.subr.bf16.mxu1 %v41_v10  ;;  %v108_v27 = vld [vmem:[%s4343_s3 + $0x10] sm:$0xff]  ;;  %v109_v28 = vld [vmem:[%s4343_s3 + $0x18] sm:$0xff]  ;;  %v2852_v31 = vld [vmem:[%s4345_s2 + $0x28] sm:$0xff]  }
   0xa   :  { %v156_v29 = vld [vmem:[%s4343_s3 + $0x190] sm:$0xff]  ;;  %v157_v30 = vld [vmem:[%s4343_s3 + $0x198] sm:$0xff]  ;;  %v2855_v34 = vld [vmem:[%s4345_s2 + $0xe0] sm:$0xff]  }
   0xb   :  { %2756 = vmatpush3.bf16.msra.mxu0 %v41_v10  ;;  %2836 = vmatpush3.bf16.msra.mxu1 %v41_v10  ;;  %v2853_v32 = vld [vmem:[%s4345_s2 + $0xd8] sm:$0xff]   ;;  %v2854_v33 = vld [vmem:[%s4345_s2 + $0x30] sm:$0xff]   ;;  %v126_v37 = vld [vmem:[%s4343_s3 + $0xa0] sm:$0xff] }
   0xc   :  { %412 = vperm.xlu0 %2840, %v154_v13   ;;  %417 = vperm.xlu1 %2841, %v155_v14   ;;  %v140_v35 = vld [vmem:[%s4343_s3 + $0x110] sm:$0xff]  ;;  %v141_v36 = vld [vmem:[%s4343_s3 + $0x118] sm:$0xff]  ;;  %v127_v38 = vld [vmem:[%s4343_s3 + $0xa8] sm:$0xff] }
   0xd   :  { %v2856_v39 = vld [vmem:[%s4345_s2 + $0x38] sm:$0xff]   ;;  %v2857_v40 = vld [vmem:[%s4345_s2 + $0xe8] sm:$0xff]   ;;  %v2858_v41 = vld [vmem:[%s4345_s2 + $0x40] sm:$0xff]  }
   0xe   :  { %2758 = vmatmul.mubr.msk.bf16.vlgmr.msra.gmra.mrb[0].mxu0 %vm650_vm0, %v2844_v15  ;;  %2802 = vmatmul.mubr.msk.bf16.vlgmr.msra.gmra.mrb[0].mxu1 %vm650_vm0, %v2845_v16  ;;  %v2859_v42 = vld [vmem:[%s4345_s2 + $0xf0] sm:$0xff]   ;;  %v110_v43 = vld [vmem:[%s4343_s3 + $0x20] sm:$0xff]  ;;  %v111_v44 = vld [vmem:[%s4343_s3 + $0x28] sm:$0xff] }
   0xf   :  { %2761 = vmatprep.mubr.msk.bf16.mxu0 %vm650_vm0, %v2846_v18  ;;  %2805 = vmatprep.mubr.msk.bf16.mxu1 %vm650_vm0, %v2847_v19  ;;  %v158_v45 = vld [vmem:[%s4343_s3 + $0x1a0] sm:$0xff]  ;;  %v159_v46 = vld [vmem:[%s4343_s3 + $0x1a8] sm:$0xff]  ;;  %v2861_v48 = vld [vmem:[%s4345_s2 + $0xf8] sm:$0xff]  }
  0x10   :  { %332 = vperm.xlu0 %2840, %v138_v17   ;;  %337 = vperm.xlu1 %2841, %v139_v20   ;;  %v2860_v47 = vld [vmem:[%s4345_s2 + $0x48] sm:$0xff]   ;;  %v2862_v49 = vld [vmem:[%s4345_s2 + $0x50] sm:$0xff]   ;;  %v142_v50 = vld [vmem:[%s4343_s3 + $0x120] sm:$0xff] }
  0x11   :  { %v143_v51 = vld [vmem:[%s4343_s3 + $0x128] sm:$0xff]  ;;  %v128_v52 = vld [vmem:[%s4343_s3 + $0xb0] sm:$0xff]  ;;  %v129_v53 = vld [vmem:[%s4343_s3 + $0xb8] sm:$0xff] }
  0x12   :  { %v2863_v54 = vld [vmem:[%s4345_s2 + $0x58] sm:$0xff]   ;;  %v2864_v55 = vld [vmem:[%s4345_s2 + $0x60] sm:$0xff]   ;;  %v112_v56 = vld [vmem:[%s4343_s3 + $0x30] sm:$0xff] }
  0x13   :  { %v113_v57 = vld [vmem:[%s4343_s3 + $0x38] sm:$0xff]  ;;  %v160_v58 = vld [vmem:[%s4343_s3 + $0x1b0] sm:$0xff]  ;;  %v2865_v60 = vld [vmem:[%s4345_s2 + $0x68] sm:$0xff]  }
  0x14   :  { %262 = vperm.xlu0 %2840, %v124_v21   ;;  %267 = vperm.xlu1 %2841, %v125_v22   ;;  %v161_v59 = vld [vmem:[%s4343_s3 + $0x1b8] sm:$0xff]  ;;  %v2866_v61 = vld [vmem:[%s4345_s2 + $0x70] sm:$0xff]   ;;  %v130_v1 = vld [vmem:[%s4343_s3 + $0xc0] sm:$0xff] }
  0x15   :  { %v144_v62 = vld [vmem:[%s4343_s3 + $0x130] sm:$0xff]  ;;  %v145_v63 = vld [vmem:[%s4343_s3 + $0x138] sm:$0xff]  ;;  %v131_v2 = vld [vmem:[%s4343_s3 + $0xc8] sm:$0xff] }
  0x16   :  { %2762 = vmatmul.mubr.msk.bf16.gmra.mrb[4].mxu0 %vm650_vm0, %v2848_v23  ;;  %2806 = vmatmul.mubr.msk.bf16.gmra.mrb[4].mxu1 %vm650_vm0, %v2849_v24  ;;  %v2867_v3 = vld [vmem:[%s4345_s2 + $0x78] sm:$0xff]   ;;  %v2868_v4 = vld [vmem:[%s4345_s2 + $0x80] sm:$0xff]   ;;  %v115_v6 = vld [vmem:[%s4343_s3 + $0x48] sm:$0xff] }
  0x17   :  { %2765 = vmatprep.mubr.msk.bf16.mxu0 %vm650_vm0, %v2850_v25  ;;  %2809 = vmatprep.mubr.msk.bf16.mxu1 %vm650_vm0, %v2851_v26  ;;  %v114_v5 = vld [vmem:[%s4343_s3 + $0x40] sm:$0xff]  ;;  %v163_v8 = vld [vmem:[%s4343_s3 + $0x1c8] sm:$0xff]  ;;  %v2870_v10 = vld [vmem:[%s4345_s2 + $0x90] sm:$0xff]  }
  0x18   :  { %182 = vperm.xlu0 %2840, %v108_v27   ;;  %187 = vperm.xlu1 %2841, %v109_v28   ;;  %v162_v7 = vld [vmem:[%s4343_s3 + $0x1c0] sm:$0xff]  ;;  %v2869_v9 = vld [vmem:[%s4345_s2 + $0x88] sm:$0xff]   ;;  %v132_v13 = vld [vmem:[%s4343_s3 + $0xd0] sm:$0xff] }
  0x19   :  { %v146_v11 = vld [vmem:[%s4343_s3 + $0x140] sm:$0xff]  ;;  %v147_v12 = vld [vmem:[%s4343_s3 + $0x148] sm:$0xff]  ;;  %v133_v14 = vld [vmem:[%s4343_s3 + $0xd8] sm:$0xff] }
  0x1a   :  { %v2871_v15 = vld [vmem:[%s4345_s2 + $0x98] sm:$0xff]   ;;  %v2872_v16 = vld [vmem:[%s4345_s2 + $0xa0] sm:$0xff]   ;;  %v116_v17 = vld [vmem:[%s4343_s3 + $0x50] sm:$0xff] }
  0x1b   :  { %v117_v18 = vld [vmem:[%s4343_s3 + $0x58] sm:$0xff]  ;;  %v164_v19 = vld [vmem:[%s4343_s3 + $0x1d0] sm:$0xff]  ;;  %v2873_v21 = vld [vmem:[%s4345_s2 + $0xa8] sm:$0xff]  }
  0x1c   :  { %422 = vperm.xlu0 %2840, %v156_v29   ;;  %427 = vperm.xlu1 %2841, %v157_v30   ;;  %v165_v20 = vld [vmem:[%s4343_s3 + $0x1d8] sm:$0xff]  ;;  %v148_v22 = vld [vmem:[%s4343_s3 + $0x150] sm:$0xff]  ;;  %v134_v24 = vld [vmem:[%s4343_s3 + $0xe0] sm:$0xff] }
  0x1d   :  { %v149_v23 = vld [vmem:[%s4343_s3 + $0x158] sm:$0xff]  ;;  %v135_v25 = vld [vmem:[%s4343_s3 + $0xe8] sm:$0xff]  ;;  %v118_v26 = vld [vmem:[%s4343_s3 + $0x60] sm:$0xff] }
  0x1e   :  { %2766 = vmatmul.mubr.msk.bf16.gmra.mrb[8].mxu0 %vm650_vm0, %v2852_v31  ;;  %2810 = vmatmul.mubr.msk.bf16.gmra.mrb[8].mxu1 %vm650_vm0, %v2853_v32  ;;  %v119_v27 = vld [vmem:[%s4343_s3 + $0x68] sm:$0xff]  ;;  %v166_v28 = vld [vmem:[%s4343_s3 + $0x1e0] sm:$0xff]  ;;  %v136_v32 = vld [vmem:[%s4343_s3 + $0xf0] sm:$0xff] }
  0x1f   :  { %2769 = vmatprep.mubr.msk.bf16.mxu0 %vm650_vm0, %v2854_v33  ;;  %2813 = vmatprep.mubr.msk.bf16.mxu1 %vm650_vm0, %v2855_v34  ;;  %v167_v29 = vld [vmem:[%s4343_s3 + $0x1e8] sm:$0xff]  ;;  %v150_v30 = vld [vmem:[%s4343_s3 + $0x160] sm:$0xff]  ;;  %v137_v33 = vld [vmem:[%s4343_s3 + $0xf8] sm:$0xff] }
  0x20   :  { %342 = vperm.xlu0 %2840, %v140_v35   ;;  %347 = vperm.xlu1 %2841, %v141_v36   ;;  %v151_v31 = vld [vmem:[%s4343_s3 + $0x168] sm:$0xff]  ;;  %v120_v34 = vld [vmem:[%s4343_s3 + $0x70] sm:$0xff]  ;;  %v121_v35 = vld [vmem:[%s4343_s3 + $0x78] sm:$0xff] }
  0x21   :  { %v168_v36 = vld [vmem:[%s4343_s3 + $0x1f0] sm:$0xff] }
  0x24   :  { %272 = vperm.xlu0 %2840, %v126_v37   ;;  %277 = vperm.xlu1 %2841, %v127_v38   ;;  %v169_v37 = vld [vmem:[%s4343_s3 + $0x1f8] sm:$0xff]  ;;  %v152_v38 = vld [vmem:[%s4343_s3 + $0x170] sm:$0xff] }
  0x26   :  { %2770 = vmatmul.mubr.msk.bf16.gmra.mrb[12].mxu0 %vm650_vm0, %v2856_v39  ;;  %2814 = vmatmul.mubr.msk.bf16.gmra.mrb[12].mxu1 %vm650_vm0, %v2857_v40  ;;  %v153_v39 = vld [vmem:[%s4343_s3 + $0x178] sm:$0xff]  ;;  %v1180_v40 = vld [vmem:[%s4346_s5 + $0x80] sm:$0xff] }
  0x27   :  { %2773 = vmatprep.mubr.msk.bf16.mxu0 %vm650_vm0, %v2858_v41  ;;  %2817 = vmatprep.mubr.msk.bf16.mxu1 %vm650_vm0, %v2859_v42  ;;  %v1181_v41 = vld [vmem:[%s4346_s5 + $0x88] sm:$0xff] }
  0x28   :  { %192 = vperm.xlu0 %2840, %v110_v43   ;;  %197 = vperm.xlu1 %2841, %v111_v44   ;;  %v1164_v44 = vld [vmem:[%s4346_s5] sm:$0xff] }
  0x2c   :  { %432 = vperm.xlu0 %2840, %v158_v45   ;;  %437 = vperm.xlu1 %2841, %v159_v46   ;;  %v1165_v45 = vld [vmem:[%s4346_s5 + $0x8] sm:$0xff] }
  0x2e   :  { %2774 = vmatmul.mubr.msk.bf16.gmra.mrb[16].mxu0 %vm650_vm0, %v2860_v47  ;;  %2818 = vmatmul.mubr.msk.bf16.gmra.mrb[16].mxu1 %vm650_vm0, %v2861_v48  ;;  %v1182_v48 = vld [vmem:[%s4346_s5 + $0x90] sm:$0xff] }
  0x2f   :  { %2777 = vmatprep.mubr.msk.bf16.mxu0 %vm650_vm0, %v2862_v49  ;;  %v1183_v49 = vld [vmem:[%s4346_s5 + $0x98] sm:$0xff] }
  0x30   :  { %352 = vperm.xlu0 %2840, %v142_v50   ;;  %357 = vperm.xlu1 %2841, %v143_v51  }
  0x34   :  { %282 = vperm.xlu0 %2840, %v128_v52   ;;  %287 = vperm.xlu1 %2841, %v129_v53   ;;  %v1166_v52 = vld [vmem:[%s4346_s5 + $0x10] sm:$0xff]  ;;  %v1167_v53 = vld [vmem:[%s4346_s5 + $0x18] sm:$0xff] }
  0x36   :  { %2778 = vmatmul.mubr.msk.bf16.gmra.mrb[20].mxu0 %vm650_vm0, %v2863_v54 }
  0x37   :  { %2781 = vmatprep.mubr.msk.bf16.mxu0 %vm650_vm0, %v2864_v55 }
  0x38   :  { %202 = vperm.xlu0 %2840, %v112_v56   ;;  %207 = vperm.xlu1 %2841, %v113_v57   ;;  %v1184_v56 = vld [vmem:[%s4346_s5 + $0xa0] sm:$0xff]  ;;  %v1185_v57 = vld [vmem:[%s4346_s5 + $0xa8] sm:$0xff] }
  0x3c   :  { %442 = vperm.xlu0 %2840, %v160_v58   ;;  %447 = vperm.xlu1 %2841, %v161_v59  }
  0x3e   :  { %2782 = vmatmul.mubr.msk.bf16.gmra.mrb[24].mxu0 %vm650_vm0, %v2865_v60  ;;  %v1168_v60 = vld [vmem:[%s4346_s5 + $0x20] sm:$0xff] }
  0x3f   :  { %2785 = vmatprep.mubr.msk.bf16.mxu0 %vm650_vm0, %v2866_v61  ;;  %v1169_v61 = vld [vmem:[%s4346_s5 + $0x28] sm:$0xff] }
  0x40   :  { %362 = vperm.xlu0 %2840, %v144_v62   ;;  %367 = vperm.xlu1 %2841, %v145_v63  }
  0x44   :  { %292 = vperm.xlu0 %2840, %v130_v1   ;;  %297 = vperm.xlu1 %2841, %v131_v2   ;;  %v1186_v1 = vld [vmem:[%s4346_s5 + $0xb0] sm:$0xff]  ;;  %v1187_v2 = vld [vmem:[%s4346_s5 + $0xb8] sm:$0xff] }
  0x46   :  { %2786 = vmatmul.mubr.msk.bf16.gmra.mrb[28].mxu0 %vm650_vm0, %v2867_v3 }
  0x47   :  { %2789 = vmatprep.mubr.msk.bf16.mxu0 %vm650_vm0, %v2868_v4 }
  0x48   :  { %212 = vperm.xlu0 %2840, %v114_v5   ;;  %217 = vperm.xlu1 %2841, %v115_v6   ;;  %v1170_v5 = vld [vmem:[%s4346_s5 + $0x30] sm:$0xff]  ;;  %v1171_v6 = vld [vmem:[%s4346_s5 + $0x38] sm:$0xff] }
  0x4c   :  { %452 = vperm.xlu0 %2840, %v162_v7   ;;  %457 = vperm.xlu1 %2841, %v163_v8  }
  0x4e   :  { %2790 = vmatmul.mubr.msk.bf16.gmra.mrb[32].mxu0 %vm650_vm0, %v2869_v9  ;;  %v1188_v9 = vld [vmem:[%s4346_s5 + $0xc0] sm:$0xff] }
  0x4f   :  { %2793 = vmatprep.mubr.msk.bf16.mxu0 %vm650_vm0, %v2870_v10  ;;  %v1189_v10 = vld [vmem:[%s4346_s5 + $0xc8] sm:$0xff] }
  0x50   :  { %372 = vperm.xlu0 %2840, %v146_v11   ;;  %377 = vperm.xlu1 %2841, %v147_v12  }
  0x54   :  { %302 = vperm.xlu0 %2840, %v132_v13   ;;  %307 = vperm.xlu1 %2841, %v133_v14   ;;  %v1172_v13 = vld [vmem:[%s4346_s5 + $0x40] sm:$0xff]  ;;  %v1173_v14 = vld [vmem:[%s4346_s5 + $0x48] sm:$0xff] }
  0x56   :  { %2794 = vmatmul.mubr.msk.bf16.gmra.mrb[36].mxu0 %vm650_vm0, %v2871_v15 }
  0x57   :  { %2797 = vmatprep.mubr.msk.bf16.mxu0 %vm650_vm0, %v2872_v16 }
  0x58   :  { %222 = vperm.xlu0 %2840, %v116_v17   ;;  %227 = vperm.xlu1 %2841, %v117_v18   ;;  %v1190_v17 = vld [vmem:[%s4346_s5 + $0xd0] sm:$0xff]  ;;  %v1191_v18 = vld [vmem:[%s4346_s5 + $0xd8] sm:$0xff] }
  0x5c   :  { %462 = vperm.xlu0 %2840, %v164_v19   ;;  %467 = vperm.xlu1 %2841, %v165_v20   ;;  %v2876_v19 = vld [vmem:[%s4347_s4 + $0x4] ss:$16 sps:$4 sm:$0xff]  }
  0x5d   :  { %1708 = vmatprep.mubr.bf16.mxu1 %v2876_v19 }
  0x5e   :  { %2798 = vmatmul.mubr.msk.bf16.gmra.mrb[40].mxu0 %vm650_vm0, %v2873_v21 }
  0x60   :  { %382 = vperm.xlu0 %2840, %v148_v22   ;;  %387 = vperm.xlu1 %2841, %v149_v23   ;;  %v1174_v22 = vld [vmem:[%s4346_s5 + $0x50] sm:$0xff]  ;;  %v1175_v23 = vld [vmem:[%s4346_s5 + $0x58] sm:$0xff] }
  0x64   :  { %312 = vperm.xlu0 %2840, %v134_v24   ;;  %317 = vperm.xlu1 %2841, %v135_v25  }
  0x68   :  { %232 = vperm.xlu0 %2840, %v118_v26   ;;  %237 = vperm.xlu1 %2841, %v119_v27   ;;  %v1192_v26 = vld [vmem:[%s4346_s5 + $0xe0] sm:$0xff]  ;;  %v1193_v27 = vld [vmem:[%s4346_s5 + $0xe8] sm:$0xff] }
  0x6c   :  { %472 = vperm.xlu0 %2840, %v166_v28   ;;  %477 = vperm.xlu1 %2841, %v167_v29  }
  0x70   :  { %392 = vperm.xlu0 %2840, %v150_v30   ;;  %397 = vperm.xlu1 %2841, %v151_v31   ;;  %v1176_v30 = vld [vmem:[%s4346_s5 + $0x60] sm:$0xff]  ;;  %v1177_v31 = vld [vmem:[%s4346_s5 + $0x68] sm:$0xff] }
  0x74   :  { %322 = vperm.xlu0 %2840, %v136_v32   ;;  %327 = vperm.xlu1 %2841, %v137_v33  }
  0x78   :  { %242 = vperm.xlu0 %2840, %v120_v34   ;;  %247 = vperm.xlu1 %2841, %v121_v35   ;;  %v1194_v34 = vld [vmem:[%s4346_s5 + $0xf0] sm:$0xff]  ;;  %v1195_v35 = vld [vmem:[%s4346_s5 + $0xf8] sm:$0xff] }
  0x7c   :  { %482 = vperm.xlu0 %2840, %v168_v36   ;;  %487 = vperm.xlu1 %2841, %v169_v37  }
  0x80   :  { %402 = vperm.xlu0 %2840, %v152_v38   ;;  %407 = vperm.xlu1 %2841, %v153_v39   ;;  %v1178_v38 = vld [vmem:[%s4346_s5 + $0x70] sm:$0xff]  ;;  %v1179_v39 = vld [vmem:[%s4346_s5 + $0x78] sm:$0xff] }
  0x81   :  { %v3400_v42 = vpop.permute.xlu0 %252 }
  0x82   :  { %v3402_v43 = vpop.permute.xlu1 %172 }
  0x84   :  { %1278 = vperm.xlu0 %2840, %v1180_v40   ;;  %1283 = vperm.xlu1 %2841, %v1181_v41  }
  0x87   :  { %v3410_v46 = vpop.permute.xlu0 %257  ;;  %v3412_v47 = vpop.permute.xlu1 %177 }
  0x88   :  { %1198 = vperm.xlu0 %2840, %v1164_v44   ;;  %1203 = vperm.xlu1 %2841, %v1165_v45   ;;  %v2038_v44 = vld [vmem:[%s4348_s7] sm:$0xff]  ;;  %v2039_v45 = vld [vmem:[%s4348_s7 + $0x8] sm:$0xff] }
  0x8b   :  { %v3420_v50 = vpop.permute.xlu0 %412  ;;  %v3422_v51 = vpop.permute.xlu1 %417 }
  0x8c   :  { %1288 = vperm.xlu0 %2840, %v1182_v48   ;;  %1293 = vperm.xlu1 %2841, %v1183_v49  }
  0x8f   :  { %v3430_v54 = vpop.permute.xlu0 %332  ;;  %v3432_v55 = vpop.permute.xlu1 %337 }
  0x90   :  { %4363 = vst [vmem:[#allocation2_spill] sm:$0xff] %v3432_v55  ;;  %1208 = vperm.xlu0 %2840, %v1166_v52   ;;  %1213 = vperm.xlu1 %2841, %v1167_v53   ;;  %v2040_v52 = vld [vmem:[%s4348_s7 + $0x10] sm:$0xff]  ;;  %v2041_v53 = vld [vmem:[%s4348_s7 + $0x18] sm:$0xff] }
  0x93   :  { %v3440_v58 = vpop.permute.xlu0 %262  ;;  %v3442_v59 = vpop.permute.xlu1 %267 }
  0x94   :  { %1298 = vperm.xlu0 %2840, %v1184_v56   ;;  %1303 = vperm.xlu1 %2841, %v1185_v57  }
  0x97   :  { %v3450_v62 = vpop.permute.xlu0 %182  ;;  %v3452_v63 = vpop.permute.xlu1 %187 }
  0x98   :  { %1218 = vperm.xlu0 %2840, %v1168_v60   ;;  %1223 = vperm.xlu1 %2841, %v1169_v61   ;;  %v2888_v60 = vld [vmem:[%s4347_s4 + $0xc] ss:$16 sps:$4 sm:$0xff]   ;;  %v2042_v61 = vld [vmem:[%s4348_s7 + $0x20] sm:$0xff] }
  0x99   :  { %1869 = vmatprep.mubr.bf16.mxu0 %v2888_v60 }
  0x9b   :  { %v3460_v3 = vpop.permute.xlu0 %422  ;;  %v3462_v4 = vpop.permute.xlu1 %427 }
  0x9c   :  { %1308 = vperm.xlu0 %2840, %v1186_v1   ;;  %1313 = vperm.xlu1 %2841, %v1187_v2   ;;  %v2043_v1 = vld [vmem:[%s4348_s7 + $0x28] sm:$0xff] }
  0x9f   :  { %v3470_v7 = vpop.permute.xlu0 %342  ;;  %v3472_v8 = vpop.permute.xlu1 %347 }
  0xa0   :  { %1228 = vperm.xlu0 %2840, %v1170_v5   ;;  %1233 = vperm.xlu1 %2841, %v1171_v6   ;;  %v2044_v6 = vld [vmem:[%s4348_s7 + $0x30] sm:$0xff] }
  0xa3   :  { %v3480_v11 = vpop.permute.xlu0 %272  ;;  %v3482_v12 = vpop.permute.xlu1 %277 }
  0xa4   :  { %1318 = vperm.xlu0 %2840, %v1188_v9   ;;  %1323 = vperm.xlu1 %2841, %v1189_v10   ;;  %v2045_v9 = vld [vmem:[%s4348_s7 + $0x38] sm:$0xff] }
  0xa7   :  { %v3490_v15 = vpop.permute.xlu0 %192  ;;  %v3492_v16 = vpop.permute.xlu1 %197 }
  0xa8   :  { %1238 = vperm.xlu0 %2840, %v1172_v13   ;;  %1243 = vperm.xlu1 %2841, %v1173_v14   ;;  %v2200_v14 = vld [vmem:[%s4349_s9] sm:$0xff] }
  0xab   :  { %v3503_v20 = vpop.permute.xlu0 %432  ;;  %v3505_v21 = vpop.permute.xlu1 %437 }
  0xac   :  { %1328 = vperm.xlu0 %2840, %v1190_v17   ;;  %1333 = vperm.xlu1 %2841, %v1191_v18  }
  0xaf   :  { %v3513_v24 = vpop.permute.xlu0 %352  ;;  %v3515_v25 = vpop.permute.xlu1 %357 }
  0xb0   :  { %4364 = vst [vmem:[#allocation3_spill] sm:$0xff] %v3513_v24  ;;  %4365 = vst [vmem:[#allocation4_spill] sm:$0xff] %v3515_v25  ;;  %1248 = vperm.xlu0 %2840, %v1174_v22   ;;  %1253 = vperm.xlu1 %2841, %v1175_v23  }
  0xb3   :  { %v3523_v28 = vpop.permute.xlu0 %282  ;;  %v3525_v29 = vpop.permute.xlu1 %287 }
  0xb4   :  { %1338 = vperm.xlu0 %2840, %v1192_v26   ;;  %1343 = vperm.xlu1 %2841, %v1193_v27  }
  0xb7   :  { %v3533_v32 = vpop.permute.xlu0 %202  ;;  %v3535_v33 = vpop.permute.xlu1 %207 }
  0xb8   :  { %1258 = vperm.xlu0 %2840, %v1176_v30   ;;  %1263 = vperm.xlu1 %2841, %v1177_v31  }
  0xbb   :  { %v3543_v36 = vpop.permute.xlu0 %442  ;;  %v3545_v37 = vpop.permute.xlu1 %447 }
  0xbc   :  { %1348 = vperm.xlu0 %2840, %v1194_v34   ;;  %1353 = vperm.xlu1 %2841, %v1195_v35  }
  0xbf   :  { %v3553_v40 = vpop.permute.xlu0 %362  ;;  %v3555_v41 = vpop.permute.xlu1 %367 }
  0xc0   :  { %4366 = vst [vmem:[#allocation5_spill] sm:$0xff] %v3553_v40  ;;  %4367 = vst [vmem:[#allocation6_spill] sm:$0xff] %v3555_v41  ;;  %1268 = vperm.xlu0 %2840, %v1178_v38   ;;  %1273 = vperm.xlu1 %2841, %v1179_v39  }
  0xc3   :  { %v3563_v48 = vpop.permute.xlu0 %292  ;;  %v3565_v49 = vpop.permute.xlu1 %297 }
  0xc4   :  { %2048 = vperm.xlu0 %2840, %v2038_v44   ;;  %2053 = vperm.xlu1 %2841, %v2039_v45  }
  0xc7   :  { %v3573_v56 = vpop.permute.xlu0 %212  ;;  %v3575_v57 = vpop.permute.xlu1 %217 }
  0xc8   :  { %2058 = vperm.xlu0 %2840, %v2040_v52   ;;  %2063 = vperm.xlu1 %2841, %v2041_v53  }
  0xcb   :  { %v3586_v2 = vpop.permute.xlu0 %452  ;;  %v3588_v5 = vpop.permute.xlu1 %457 }
  0xcc   :  { %2068 = vperm.xlu0 %2840, %v2042_v61   ;;  %2073 = vperm.xlu1 %2841, %v2043_v1  }
  0xcf   :  { %v3596_v10 = vpop.permute.xlu0 %372  ;;  %v3598_v13 = vpop.permute.xlu1 %377 }
  0xd0   :  { %4368 = vst [vmem:[#allocation7_spill] sm:$0xff] %v3596_v10  ;;  %4369 = vst [vmem:[#allocation8_spill] sm:$0xff] %v3598_v13  ;;  %2078 = vperm.xlu0 %2840, %v2044_v6   ;;  %2083 = vperm.xlu1 %2841, %v2045_v9  }
  0xd3   :  { %v3603_v17 = vpop.permute.xlu0 %302  ;;  %v3605_v18 = vpop.permute.xlu1 %307 }
  0xd4   :  { %2203 = vperm.xlu0 %2840, %v2200_v14  }
  0xd7   :  { %v223_v19 = vpop.permute.xlu0 %222  ;;  %v228_v22 = vpop.permute.xlu1 %227 }
  0xdb   :  { %v3607_v23 = vpop.permute.xlu0 %462  ;;  %v3609_v26 = vpop.permute.xlu1 %467 }
  0xdf   :  { %v3611_v27 = vpop.permute.xlu0 %382  ;;  %v3613_v30 = vpop.permute.xlu1 %387 }
  0xe0   :  { %4370 = vst [vmem:[#allocation9_spill] sm:$0xff] %v3611_v27  ;;  %4371 = vst [vmem:[#allocation10_spill] sm:$0xff] %v3613_v30 }
  0xe1   :  { %v2759_v31 = vpop.f32.mrb[0].mxu0  ;;  %v3615_v34 = vpop.f32.mrb[0].mxu1 }
  0xe2   :  { %v781_v35 = vpop.f32.mrb[1].mxu0  ;;  %v957_v38 = vpop.f32.mrb[1].mxu1  ;;  %v3624_v53 = vadd.f32 %v2759_v31, %v3450_v62 }
  0xe3   :  { %v3617_v39 = vpop.permute.xlu0 %312  ;;  %v3619_v44 = vpop.permute.xlu1 %317  ;;  %v3630_v6 = vadd.f32 %v781_v35, %v3402_v43 }
  0xe4   :  { %v2760_v45 = vpop.f32.mrb[2].mxu0  ;;  %v3621_v52 = vpop.f32.mrb[2].mxu1 }
  0xe5   :  { %v3627_v60 = vadd.f32 %v2760_v45, %v3452_v63  ;;  %v784_v61 = vpop.f32.mrb[3].mxu0  ;;  %v960_v1 = vpop.f32.mrb[3].mxu1 }
  0xe6   :  { %v3633_v9 = vadd.f32 %v784_v61, %v3412_v47 }
  0xe7   :  { %v3637_v0 = vpop.permute.xlu0 %232  ;;  %v3639_v13 = vpop.permute.xlu1 %237 }
  0xe9   :  { %v2763_v63 = vpop.f32.mrb[4].mxu0  ;;  %v2807_v31 = vpop.f32.mrb[4].mxu1 }
  0xea   :  { %v797_v45 = vpop.f32.mrb[5].mxu0  ;;  %v973_v10 = vpop.f32.mrb[5].mxu1  ;;  %v3648_v61 = vadd.f32 %v2763_v63, %v3533_v32  ;;  %v3651_v14 = vadd.f32 %v2807_v31, %v3460_v3  ;;  %v4375_v3 = vmov 0  }
  0xeb   :  { %v3643_v30 = vpop.permute.xlu0 %472  ;;  %v3645_v43 = vpop.permute.xlu1 %477  ;;  %v3660_v41 = vadd.f32 %v797_v45, %v3490_v15  ;;  %v974_v40 = vadd.f32 %v973_v10, %v3420_v50 }
  0xec   :  { %v2764_v47 = vpop.f32.mrb[6].mxu0  ;;  %v2808_v35 = vpop.f32.mrb[6].mxu1 }
  0xed   :  { %v3654_v27 = vadd.f32 %v2764_v47, %v3535_v33  ;;  %v3657_v62 = vadd.f32 %v2808_v35, %v3462_v4  ;;  %v800_v25 = vpop.f32.mrb[7].mxu0  ;;  %v976_v24 = vpop.f32.mrb[7].mxu1 }
  0xee   :  { %v3664_v55 = vadd.f32 %v800_v25, %v3492_v16  ;;  %v977_v32 = vadd.f32 %v976_v24, %v3422_v51 }
  0xef   :  { %v393_v4 = vpop.permute.xlu0 %392  ;;  %v398_v63 = vpop.permute.xlu1 %397 }
  0xf0   :  { %v1060_v15 = vpack.c.bf16 %v977_v32, %v974_v40  ;;  %v3673_v45 = vadd.f32 %v957_v38, %v393_v4  ;;  %v3675_v50 = vadd.f32 %v960_v1, %v398_v63 }
  0xf1   :  { %v2767_v16 = vpop.f32.mrb[8].mxu0  ;;  %v2811_v25 = vpop.f32.mrb[8].mxu1 }
  0xf2   :  { %4372 = vst [vmem:[#allocation11_spill] sm:$0xff] %v3673_v45  ;;  %4373 = vst [vmem:[#allocation12_spill] sm:$0xff] %v3675_v50  ;;  %v3680_v24 = vadd.f32 %v2811_v25, %v3543_v36  ;;  %v813_v10 = vpop.f32.mrb[9].mxu0  ;;  %v989_v47 = vpop.f32.mrb[9].mxu1  ;;  %v1092_v40 = vmax.bf16 %v4375_v3, %v1060_v15  ;;  %v3687_v1 = vadd.f32 %v2767_v16, %v223_v19 }
  0xf3   :  { %v3682_v35 = vpop.permute.xlu0 %322  ;;  %v3684_v33 = vpop.permute.xlu1 %327  ;;  %v3695_v51 = vadd.f32 %v813_v10, %v3573_v56  ;;  %v3698_v31 = vadd.f32 %v989_v47, %v3503_v20 }
  0xf4   :  { %4374 = vst [vmem:[#allocation13_spill] sm:$0xff] %v3680_v24  ;;  %v2768_v38 = vpop.f32.mrb[10].mxu0  ;;  %v2812_v32 = vpop.f32.mrb[10].mxu1  ;;  %2596 = vmatprep.subr.bf16.mxu0 %v1092_v40 }
  0xf5   :  { %v3689_v4 = vadd.f32 %v2768_v38, %v228_v22  ;;  %v3692_v63 = vadd.f32 %v2812_v32, %v3545_v37  ;;  %v816_v36 = vpop.f32.mrb[11].mxu0  ;;  %v992_v25 = vpop.f32.mrb[11].mxu1  ;;  %4377 = vst [vmem:[#allocation15_spill] sm:$0xff] %v3698_v31 }
  0xf6   :  { %v3701_v15 = vadd.f32 %v816_v36, %v3575_v57  ;;  %v3704_v19 = vadd.f32 %v992_v25, %v3505_v21 }
  0xf7   :  { %4376 = vst [vmem:[#allocation14_spill] sm:$0xff] %v3692_v63  ;;  %v243_v16 = vpop.permute.xlu0 %242  ;;  %v248_v40 = vpop.permute.xlu1 %247 }
  0xf9   :  { %v2771_v10 = vpop.f32.mrb[12].mxu0  ;;  %v2815_v57 = vpop.f32.mrb[12].mxu1 }
  0xfa   :  { %v829_v47 = vpop.f32.mrb[13].mxu0  ;;  %v1005_v38 = vpop.f32.mrb[13].mxu1  ;;  %v3714_v22 = vadd.f32 %v2771_v10, %v243_v16  ;;  %v3717_v37 = vadd.f32 %v2815_v57, %v3607_v23 }
  0xfb   :  { %v483_v21 = vpop.permute.xlu0 %482  ;;  %v488_v32 = vpop.permute.xlu1 %487  ;;  %v3725_v24 = vadd.f32 %v829_v47, %v3637_v0  ;;  %v3728_v63 = vadd.f32 %v1005_v38, %v3586_v2 }
  0xfc   :  { %v2772_v36 = vpop.f32.mrb[14].mxu0  ;;  %v2816_v25 = vpop.f32.mrb[14].mxu1 }
  0xfd   :  { %v3719_v45 = vadd.f32 %v2772_v36, %v248_v40  ;;  %v3722_v56 = vadd.f32 %v2816_v25, %v3609_v26  ;;  %v832_v50 = vpop.f32.mrb[15].mxu0  ;;  %v1008_v20 = vpop.f32.mrb[15].mxu1 }
  0xfe   :  { %v3731_v31 = vadd.f32 %v832_v50, %v3639_v13  ;;  %v3734_v16 = vadd.f32 %v1008_v20, %v3588_v5 }
  0xff   :  { %v403_v40 = vpop.permute.xlu0 %402  ;;  %v408_v10 = vpop.permute.xlu1 %407 }
 0x100   :  { %v3745_v13 = vadd.f32 %v3615_v34, %v403_v40  ;;  %v3748_v5 = vadd.f32 %v3621_v52, %v408_v10 }
 0x101   :  { %v2775_v50 = vpop.f32.mrb[16].mxu0  ;;  %v2819_v20 = vpop.f32.mrb[16].mxu1 }
 0x102   :  { %4378 = vst [vmem:[#allocation16_spill] sm:$0xff] %v3745_v13  ;;  %4379 = vst [vmem:[#allocation17_spill] sm:$0xff] %v3748_v5  ;;  %v845_v47 = vpop.f32.mrb[17].mxu0  ;;  %v1021_v38 = vpop.f32.mrb[17].mxu1  ;;  %v854_v26 = vadd.f32 %v2775_v50, %v3440_v58  ;;  %v3753_v23 = vadd.f32 %v2819_v20, %v483_v21 }
 0x103   :  { %v2776_v36 = vpop.f32.mrb[18].mxu0  ;;  %v2820_v25 = vpop.f32.mrb[18].mxu1  ;;  %v846_v10 = vadd.f32 %v845_v47, %v3400_v42  ;;  %v3760_v0 = vadd.f32 %v1021_v38, %v3643_v30  ;;  %v4380_v30 = vpack.c.bf16 %v3633_v9, %v3630_v6  ;;  %v4381_v6 = vpack.c.bf16 %v3627_v60, %v3624_v53 }
 0x104   :  { %v857_v2 = vadd.f32 %v2776_v36, %v3442_v59  ;;  %v3756_v34 = vadd.f32 %v2820_v25, %v488_v32  ;;  %v848_v40 = vpop.f32.mrb[19].mxu0  ;;  %v1024_v52 = vpop.f32.mrb[19].mxu1 }
 0x105   :  { %v849_v57 = vadd.f32 %v848_v40, %v3410_v46  ;;  %v3764_v13 = vadd.f32 %v1024_v52, %v3645_v43  ;;  %v1068_v46 = vmax.bf16 %v4375_v3, %v4380_v30  ;;  %v1069_v9 = vmax.bf16 %v4375_v3, %v4381_v6 }
 0x106   :  { %v1045_v5 = vpack.c.bf16 %v857_v2, %v854_v26  ;;  %v1067_v58 = vpack.c.bf16 %v3756_v34, %v3753_v23  ;;  %v2891_v23 = vld [vmem:[%s4347_s4 + $0x80] ss:$16 sps:$4 sm:$0xff]   ;;  %v2892_v34 = vld [vmem:[%s4347_s4 + $0x2c] ss:$16 sps:$4 sm:$0xff]  }
 0x107   :  { %v1044_v21 = vpack.c.bf16 %v849_v57, %v846_v10  ;;  %v1066_v59 = vpack.c.bf16 %v3764_v13, %v3760_v0 }
 0x108   :  { %v1077_v43 = vmax.bf16 %v4375_v3, %v1045_v5  ;;  %v1099_v0 = vmax.bf16 %v4375_v3, %v1067_v58  ;;  %v2894_v58 = vld [vmem:[%s4347_s4 + $0xa4] ss:$16 sps:$4 sm:$0xff]  }
 0x109   :  { %v2779_v32 = vpop.f32.mrb[20].mxu0  ;;  %v1076_v42 = vmax.bf16 %v4375_v3, %v1044_v21  ;;  %v4408_v13 = vld [vmem:[#allocation17_spill] sm:$0xff] }
 0x10a   :  { %v861_v50 = vpop.f32.mrb[21].mxu0  ;;  %v870_v26 = vadd.f32 %v2779_v32, %v3523_v28 }
 0x10b   :  { %v2780_v20 = vpop.f32.mrb[22].mxu0  ;;  %2484 = vmatprep.subr.bf16.mxu1 %v1076_v42  ;;  %v862_v47 = vadd.f32 %v861_v50, %v3480_v11 }
 0x10c   :  { %v873_v2 = vadd.f32 %v2780_v20, %v3525_v29  ;;  %v864_v57 = vpop.f32.mrb[23].mxu0  ;;  %2485 = vmatpush3.bf16.msra.mxu1 %v1068_v46  ;;  %v4382_v29 = vpack.c.bf16 %v3664_v55, %v3660_v41  ;;  %v4383_v55 = vpack.c.bf16 %v3654_v27, %v3648_v61 }
 0x10d   :  { %v865_v38 = vadd.f32 %v864_v57, %v3482_v12  ;;  %2486 = vmatprep.subr.bf16.mxu1 %v1077_v43 }
 0x10e   :  { %v1047_v36 = vpack.c.bf16 %v873_v2, %v870_v26  ;;  %v1070_v11 = vmax.bf16 %v4375_v3, %v4382_v29  ;;  %v1071_v41 = vmax.bf16 %v4375_v3, %v4383_v55 }
 0x10f   :  { %v1046_v25 = vpack.c.bf16 %v865_v38, %v862_v47 }
 0x110   :  { %2487 = vmatpush3.bf16.msra.mxu1 %v1069_v9  ;;  %v1079_v12 = vmax.bf16 %v4375_v3, %v1047_v36 }
 0x111   :  { %v2783_v5 = vpop.f32.mrb[24].mxu0  ;;  %v1078_v28 = vmax.bf16 %v4375_v3, %v1046_v25 }
 0x112   :  { %v877_v40 = vpop.f32.mrb[25].mxu0  ;;  %v886_v53 = vadd.f32 %v2783_v5, %v3603_v17  ;;  %v4387_v5 = vld [vmem:[#allocation2_spill] sm:$0xff] }
 0x113   :  { %v2784_v52 = vpop.f32.mrb[26].mxu0  ;;  %2488 = vmatprep.subr.bf16.mxu1 %v1078_v28  ;;  %v878_v21 = vadd.f32 %v877_v40, %v3563_v48 }
 0x114   :  { %v889_v60 = vadd.f32 %v2784_v52, %v3605_v18  ;;  %v880_v10 = vpop.f32.mrb[27].mxu0  ;;  %2489 = vmatpush3.bf16.msra.mxu1 %v1070_v11  ;;  %v4384_v18 = vpack.c.bf16 %v3701_v15, %v3695_v51  ;;  %v4385_v51 = vpack.c.bf16 %v3689_v4, %v3687_v1 }
 0x115   :  { %v881_v32 = vadd.f32 %v880_v10, %v3565_v49  ;;  %2490 = vmatprep.subr.bf16.mxu1 %v1079_v12  ;;  %v4391_v10 = vld [vmem:[#allocation6_spill] sm:$0xff] }
 0x116   :  { %v1049_v50 = vpack.c.bf16 %v889_v60, %v886_v53  ;;  %v1072_v48 = vmax.bf16 %v4375_v3, %v4384_v18  ;;  %v1073_v15 = vmax.bf16 %v4375_v3, %v4385_v51  ;;  %v4390_v53 = vld [vmem:[#allocation5_spill] sm:$0xff] }
 0x117   :  { %v1048_v42 = vpack.c.bf16 %v881_v32, %v878_v21 }
 0x118   :  { %2491 = vmatpush3.bf16.msra.mxu1 %v1071_v41  ;;  %v1081_v49 = vmax.bf16 %v4375_v3, %v1049_v50  ;;  %v4392_v41 = vld [vmem:[#allocation3_spill] sm:$0xff] }
 0x119   :  { %v2787_v30 = vpop.f32.mrb[28].mxu0  ;;  %v1080_v17 = vmax.bf16 %v4375_v3, %v1048_v42  ;;  %v4393_v42 = vld [vmem:[#allocation4_spill] sm:$0xff] }
 0x11a   :  { %v893_v46 = vpop.f32.mrb[29].mxu0  ;;  %v902_v27 = vadd.f32 %v2787_v30, %v3682_v35 }
 0x11b   :  { %v2788_v20 = vpop.f32.mrb[30].mxu0  ;;  %2492 = vmatprep.subr.bf16.mxu1 %v1080_v17  ;;  %v894_v26 = vadd.f32 %v893_v46, %v3617_v39 }
 0x11c   :  { %v905_v61 = vadd.f32 %v2788_v20, %v3684_v33  ;;  %v896_v43 = vpop.f32.mrb[31].mxu0  ;;  %2493 = vmatpush3.bf16.msra.mxu1 %v1072_v48  ;;  %v4386_v33 = vpack.c.bf16 %v3731_v31, %v3725_v24  ;;  %v4388_v31 = vpack.c.bf16 %v3719_v45, %v3714_v22  ;;  %v4389_v45 = vpack.c.bf16 %v3657_v62, %v3651_v14  ;;  %v4394_v14 = vld [vmem:[#allocation15_spill] sm:$0xff]  ;;  %v2879_v48 = vld [vmem:[%s4347_s4 + $0x20] ss:$16 sps:$4 sm:$0xff]  }
 0x11d   :  { %v897_v2 = vadd.f32 %v896_v43, %v3619_v44  ;;  %2494 = vmatprep.subr.bf16.mxu1 %v1081_v49  ;;  %v4395_v62 = vpack.c.bf16 %v3704_v19, %v4394_v14  ;;  %v2880_v49 = vld [vmem:[%s4347_s4 + $0x44] ss:$16 sps:$4 sm:$0xff]   ;;  %v2915_v14 = vld [vmem:[%s4347_s4 + $0x100] ss:$16 sps:$4 sm:$0xff]  }
 0x11e   :  { %v1051_v57 = vpack.c.bf16 %v905_v61, %v902_v27  ;;  %v1074_v39 = vmax.bf16 %v4375_v3, %v4386_v33  ;;  %v1075_v24 = vmax.bf16 %v4375_v3, %v4388_v31  ;;  %v1093_v22 = vmax.bf16 %v4375_v3, %v4389_v45  ;;  %v4396_v43 = vld [vmem:[#allocation14_spill] sm:$0xff]  ;;  %v4401_v33 = vld [vmem:[#allocation7_spill] sm:$0xff] }
 0x11f   :  { %v1050_v47 = vpack.c.bf16 %v897_v2, %v894_v26  ;;  %v1094_v17 = vmax.bf16 %v4375_v3, %v4395_v62  ;;  %v4397_v26 = vld [vmem:[#allocation13_spill] sm:$0xff] }
 0x120   :  { %2495 = vmatpush3.bf16.msra.mxu1 %v1073_v15  ;;  %v1083_v44 = vmax.bf16 %v4375_v3, %v1051_v57  ;;  %v4398_v19 = vpack.c.bf16 %v4396_v43, %v4397_v26  ;;  %v4399_v15 = vld [vmem:[#allocation9_spill] sm:$0xff]  ;;  %v2930_v26 = vld [vmem:[%s4347_s4 + $0x164] ss:$16 sps:$4 sm:$0xff]  }
 0x121   :  { %v2791_v38 = vpop.f32.mrb[32].mxu0  ;;  %v1082_v35 = vmax.bf16 %v4375_v3, %v1050_v47  ;;  %v4400_v47 = vld [vmem:[#allocation10_spill] sm:$0xff]  ;;  %v2886_v45 = vld [vmem:[%s4347_s4 + $0x8] ss:$16 sps:$4 sm:$0xff]   ;;  %v2916_v62 = vld [vmem:[%s4347_s4 + $0xac] ss:$16 sps:$4 sm:$0xff]  }
 0x122   :  { %v909_v6 = vpop.f32.mrb[33].mxu0  ;;  %v918_v1 = vadd.f32 %v2791_v38, %v3470_v7  ;;  %v2874_v7 = vld [vmem:[%s4347_s4] ss:$16 sps:$4 sm:$0xff]   ;;  %v1095_v2 = vmax.bf16 %v4375_v3, %v4398_v19  ;;  %v2928_v43 = vld [vmem:[%s4347_s4 + $0xec] ss:$16 sps:$4 sm:$0xff]  }
 0x123   :  { %v2792_v9 = vpop.f32.mrb[34].mxu0  ;;  %2496 = vmatprep.subr.bf16.mxu1 %v1082_v35  ;;  %v910_v25 = vadd.f32 %v909_v6, %v3430_v54  ;;  %v2877_v54 = vld [vmem:[%s4347_s4 + $0x24] ss:$16 sps:$4 sm:$0xff]   ;;  %v2932_v19 = vld [vmem:[%s4347_s4 + $0xe8] ss:$16 sps:$4 sm:$0xff]  }
 0x124   :  { %v921_v4 = vadd.f32 %v2792_v9, %v3472_v8  ;;  %v912_v36 = vpop.f32.mrb[35].mxu0  ;;  %2497 = vmatpush3.bf16.msra.mxu1 %v1074_v39  ;;  %v4402_v9 = vld [vmem:[#allocation8_spill] sm:$0xff] }
 0x125   :  { %v913_v40 = vadd.f32 %v912_v36, %v4387_v5  ;;  %2498 = vmatprep.subr.bf16.mxu1 %v1083_v44  ;;  %v2882_v5 = vld [vmem:[%s4347_s4 + $0x40] ss:$16 sps:$4 sm:$0xff]  }
 0x126   :  { %v1053_v28 = vpack.c.bf16 %v921_v4, %v918_v1  ;;  %v4403_v4 = vpack.c.bf16 %v3734_v16, %v3728_v63 }
 0x127   :  { %v1052_v29 = vpack.c.bf16 %v913_v40, %v910_v25  ;;  %v2883_v40 = vld [vmem:[%s4347_s4 + $0x64] ss:$16 sps:$4 sm:$0xff]  }
 0x128   :  { %2499 = vmatpush3.bf16.msra.mxu1 %v1075_v24  ;;  %v1085_v55 = vmax.bf16 %v4375_v3, %v1053_v28  ;;  %v1096_v36 = vmax.bf16 %v4375_v3, %v4403_v4  ;;  %v4404_v24 = vpack.c.bf16 %v3722_v56, %v3717_v37  ;;  %v1098_v28 = vmax.bf16 %v4375_v3, %v1066_v59  ;;  %v2889_v37 = vld [vmem:[%s4347_s4 + $0x84] ss:$16 sps:$4 sm:$0xff]   ;;  %v2952_v4 = vld [vmem:[%s4347_s4 + $0x16c] ss:$16 sps:$4 sm:$0xff]  }
 0x129   :  { %v2795_v8 = vpop.f32.mrb[36].mxu0  ;;  %v1084_v11 = vmax.bf16 %v4375_v3, %v1052_v29  ;;  %v2885_v29 = vld [vmem:[%s4347_s4 + $0x60] ss:$16 sps:$4 sm:$0xff]  }
 0x12a   :  { %v925_v52 = vpop.f32.mrb[37].mxu0  ;;  %v934_v60 = vadd.f32 %v2795_v8, %v4390_v53  ;;  %v1097_v63 = vmax.bf16 %v4375_v3, %v4404_v24  ;;  %v4405_v56 = vld [vmem:[#allocation12_spill] sm:$0xff]  ;;  %v2898_v53 = vld [vmem:[%s4347_s4 + $0x4c] ss:$16 sps:$4 sm:$0xff]  }
 0x12b   :  { %v2796_v12 = vpop.f32.mrb[38].mxu0  ;;  %1709 = vmatmul.mubr.bf16.vlgmr.msra.gmra.mrb[20].mxu1 %v2874_v7  ;;  %2597 = vmatpush3.bf16.msra.mxu0 %v1084_v11  ;;  %v926_v50 = vadd.f32 %v925_v52, %v4392_v41  ;;  %v4406_v7 = vld [vmem:[#allocation11_spill] sm:$0xff]  ;;  %v4409_v59 = vld [vmem:[#allocation16_spill] sm:$0xff] }
 0x12c   :  { %v937_v21 = vadd.f32 %v2796_v12, %v4391_v10  ;;  %v928_v32 = vpop.f32.mrb[39].mxu0  ;;  %2598 = vmatprep.subr.bf16.mxu0 %v1093_v22  ;;  %1716 = vmatprep.mubr.bf16.mxu1 %v2877_v54  ;;  %v4407_v8 = vpack.c.bf16 %v4405_v56, %v4406_v7  ;;  %v4410_v11 = vpack.c.bf16 %v4408_v13, %v4409_v59  ;;  %v2896_v22 = vld [vmem:[%s4347_s4 + $0x28] ss:$16 sps:$4 sm:$0xff]   ;;  %v2897_v12 = vld [vmem:[%s4347_s4 + $0xa0] ss:$16 sps:$4 sm:$0xff]   ;;  %v4062_v56 = vpop.permute.xlu0 %1278 }
 0x12d   :  { %v929_v30 = vadd.f32 %v928_v32, %v4393_v42  ;;  %v2902_v10 = vld [vmem:[%s4347_s4 + $0x48] ss:$16 sps:$4 sm:$0xff]   ;;  %v2904_v32 = vld [vmem:[%s4347_s4 + $0x6c] ss:$16 sps:$4 sm:$0xff]   ;;  %v4064_v7 = vpop.permute.xlu1 %1283 }
 0x12e   :  { %v1055_v46 = vpack.c.bf16 %v937_v21, %v934_v60  ;;  %v1090_v54 = vmax.bf16 %v4375_v3, %v4407_v8  ;;  %v1091_v52 = vmax.bf16 %v4375_v3, %v4410_v11  ;;  %v2900_v60 = vld [vmem:[%s4347_s4 + $0xc4] ss:$16 sps:$4 sm:$0xff]   ;;  %v2903_v21 = vld [vmem:[%s4347_s4 + $0xc0] ss:$16 sps:$4 sm:$0xff]   ;;  %v2908_v41 = vld [vmem:[%s4347_s4 + $0x68] ss:$16 sps:$4 sm:$0xff]  }
 0x12f   :  { %v1054_v18 = vpack.c.bf16 %v929_v30, %v926_v50  ;;  %2599 = vmatpush3.bf16.msra.mxu0 %v1085_v55  ;;  %v2906_v55 = vld [vmem:[%s4347_s4 + $0xe4] ss:$16 sps:$4 sm:$0xff]   ;;  %v2909_v50 = vld [vmem:[%s4347_s4 + $0xe0] ss:$16 sps:$4 sm:$0xff]   ;;  %v2910_v42 = vld [vmem:[%s4347_s4 + $0x8c] ss:$16 sps:$4 sm:$0xff]  }
 0x130   :  { %2600 = vmatprep.subr.bf16.mxu0 %v1094_v17  ;;  %v1087_v35 = vmax.bf16 %v4375_v3, %v1055_v46  ;;  %v2912_v30 = vld [vmem:[%s4347_s4 + $0x104] ss:$16 sps:$4 sm:$0xff]   ;;  %v2914_v46 = vld [vmem:[%s4347_s4 + $0x88] ss:$16 sps:$4 sm:$0xff]   ;;  %v2961_v24 = vld [vmem:[%s4347_s4 + $0x1ac] ss:$16 sps:$4 sm:$0xff]   ;;  %v1199_v8 = vpop.permute.xlu0 %1198 }
 0x131   :  { %v2799_v20 = vpop.f32.mrb[40].mxu0  ;;  %v1086_v27 = vmax.bf16 %v4375_v3, %v1054_v18  ;;  %v2918_v17 = vld [vmem:[%s4347_s4 + $0x124] ss:$16 sps:$4 sm:$0xff]   ;;  %v2920_v18 = vld [vmem:[%s4347_s4 + $0xa8] ss:$16 sps:$4 sm:$0xff]  }
 0x132   :  { %v941_v61 = vpop.f32.mrb[41].mxu0  ;;  %v950_v57 = vadd.f32 %v2799_v20, %v4399_v15  ;;  %v2922_v20 = vld [vmem:[%s4347_s4 + $0xcc] ss:$16 sps:$4 sm:$0xff]   ;;  %v2936_v15 = vld [vmem:[%s4347_s4 + $0x184] ss:$16 sps:$4 sm:$0xff]  }
 0x133   :  { %v2800_v51 = vpop.f32.mrb[42].mxu0  ;;  %1717 = vmatmul.mubr.bf16.gmra.mrb[24].mxu1 %v2879_v48  ;;  %2601 = vmatpush3.bf16.msra.mxu0 %v1086_v27  ;;  %v942_v39 = vadd.f32 %v941_v61, %v4401_v33  ;;  %v2921_v48 = vld [vmem:[%s4347_s4 + $0x120] ss:$16 sps:$4 sm:$0xff]   ;;  %v2926_v27 = vld [vmem:[%s4347_s4 + $0xc8] ss:$16 sps:$4 sm:$0xff]  }
 0x134   :  { %v953_v38 = vadd.f32 %v2800_v51, %v4400_v47  ;;  %v944_v6 = vpop.f32.mrb[43].mxu0  ;;  %2602 = vmatprep.subr.bf16.mxu0 %v1095_v2  ;;  %1724 = vmatprep.mubr.bf16.mxu1 %v2880_v49  ;;  %v2924_v49 = vld [vmem:[%s4347_s4 + $0x144] ss:$16 sps:$4 sm:$0xff]   ;;  %v2927_v61 = vld [vmem:[%s4347_s4 + $0x140] ss:$16 sps:$4 sm:$0xff]  }
 0x135   :  { %v945_v44 = vadd.f32 %v944_v6, %v4402_v9  ;;  %v2933_v2 = vld [vmem:[%s4347_s4 + $0x160] ss:$16 sps:$4 sm:$0xff]   ;;  %v2934_v51 = vld [vmem:[%s4347_s4 + $0x10c] ss:$16 sps:$4 sm:$0xff]   ;;  %v2942_v6 = vld [vmem:[%s4347_s4 + $0x1a4] ss:$16 sps:$4 sm:$0xff]  }
 0x136   :  { %v1057_v1 = vpack.c.bf16 %v953_v38, %v950_v57  ;;  %v2938_v57 = vld [vmem:[%s4347_s4 + $0x108] ss:$16 sps:$4 sm:$0xff]   ;;  %v2939_v47 = vld [vmem:[%s4347_s4 + $0x180] ss:$16 sps:$4 sm:$0xff]   ;;  %v2940_v38 = vld [vmem:[%s4347_s4 + $0x12c] ss:$16 sps:$4 sm:$0xff]  }
 0x137   :  { %v1056_v25 = vpack.c.bf16 %v945_v44, %v942_v39  ;;  %2603 = vmatpush3.bf16.msra.mxu0 %v1087_v35  ;;  %v2944_v35 = vld [vmem:[%s4347_s4 + $0x128] ss:$16 sps:$4 sm:$0xff]   ;;  %v2945_v33 = vld [vmem:[%s4347_s4 + $0x1a0] ss:$16 sps:$4 sm:$0xff]   ;;  %v2946_v39 = vld [vmem:[%s4347_s4 + $0x14c] ss:$16 sps:$4 sm:$0xff]  }
 0x138   :  { %2604 = vmatprep.subr.bf16.mxu0 %v1096_v36  ;;  %v1089_v16 = vmax.bf16 %v4375_v3, %v1057_v1  ;;  %v2948_v9 = vld [vmem:[%s4347_s4 + $0x1c4] ss:$16 sps:$4 sm:$0xff]   ;;  %v2950_v44 = vld [vmem:[%s4347_s4 + $0x148] ss:$16 sps:$4 sm:$0xff]   ;;  %v2951_v1 = vld [vmem:[%s4347_s4 + $0x1c0] ss:$16 sps:$4 sm:$0xff]  }
 0x139   :  { %v1088_v31 = vmax.bf16 %v4375_v3, %v1056_v25  ;;  %v2954_v36 = vld [vmem:[%s4347_s4 + $0x1e4] ss:$16 sps:$4 sm:$0xff]   ;;  %v2956_v25 = vld [vmem:[%s4347_s4 + $0x168] ss:$16 sps:$4 sm:$0xff]  }
 0x13b   :  { %1725 = vmatmul.mubr.bf16.gmra.mrb[28].mxu1 %v2882_v5  ;;  %2605 = vmatpush3.bf16.msra.mxu0 %v1088_v31  ;;  %v2957_v5 = vld [vmem:[%s4347_s4 + $0x1e0] ss:$16 sps:$4 sm:$0xff]   ;;  %v2960_v31 = vld [vmem:[%s4347_s4 + $0x188] ss:$16 sps:$4 sm:$0xff]  }
 0x13c   :  { %2606 = vmatprep.subr.bf16.mxu0 %v1097_v63  ;;  %1732 = vmatprep.mubr.bf16.mxu1 %v2883_v40  ;;  %v2958_v40 = vld [vmem:[%s4347_s4 + $0x18c] ss:$16 sps:$4 sm:$0xff]   ;;  %v2963_v63 = vld [vmem:[%s4347_s4 + $0x1a8] ss:$16 sps:$4 sm:$0xff]  }
 0x13f   :  { %2607 = vmatpush3.bf16.msra.mxu0 %v1089_v16  ;;  %v2964_v16 = vld [vmem:[%s4347_s4 + $0x1cc] ss:$16 sps:$4 sm:$0xff]  }
 0x140   :  { %2608 = vmatprep.subr.bf16.mxu0 %v1098_v28  ;;  %v2966_v28 = vld [vmem:[%s4347_s4 + $0x1c8] ss:$16 sps:$4 sm:$0xff]  }
 0x143   :  { %1733 = vmatmul.mubr.bf16.gmra.mrb[32].mxu1 %v2885_v29  ;;  %2609 = vmatpush3.bf16.msra.mxu0 %v1090_v54  ;;  %v2967_v29 = vld [vmem:[%s4347_s4 + $0x1ec] ss:$16 sps:$4 sm:$0xff]   ;;  %v1204_v54 = vpop.permute.xlu1 %1203 }
 0x144   :  { %2610 = vmatprep.subr.bf16.mxu0 %v1099_v0  ;;  %1740 = vmatprep.mubr.bf16.mxu1 %v2889_v37  ;;  %v2969_v37 = vld [vmem:[%s4347_s4 + $0x1e8] ss:$16 sps:$4 sm:$0xff]   ;;  %v4066_v0 = vpop.permute.xlu0 %1288 }
 0x147   :  { %2611 = vmatpush3.bf16.msra.mxu0 %v1091_v52  ;;  %v4068_v13 = vpop.permute.xlu1 %1293 }
 0x148   :  { %v1209_v59 = vpop.permute.xlu0 %1208 }
 0x14a   :  { %1870 = vmatmul.mubr.bf16.vlgmr.msra.gmra.mrb[44].mxu0 %v2886_v45 }
 0x14b   :  { %1741 = vmatmul.mubr.bf16.gmra.mrb[36].mxu1 %v2891_v23  ;;  %1877 = vmatprep.mubr.bf16.mxu0 %v2892_v34  ;;  %v4070_v52 = vpop.permute.xlu1 %1213 }
 0x14c   :  { %1748 = vmatprep.mubr.bf16.mxu1 %v2894_v58 }
 0x152   :  { %1878 = vmatmul.mubr.bf16.gmra.mrb[48].mxu0 %v2896_v22 }
 0x153   :  { %1749 = vmatmul.mubr.bf16.gmra.mrb[40].mxu1 %v2897_v12  ;;  %1885 = vmatprep.mubr.bf16.mxu0 %v2898_v53  ;;  %v4072_v12 = vpop.permute.xlu0 %1298  ;;  %v4074_v53 = vpop.permute.xlu1 %1303 }
 0x154   :  { %1756 = vmatprep.mubr.bf16.mxu1 %v2900_v60 }
 0x15a   :  { %1886 = vmatmul.mubr.bf16.gmra.mrb[52].mxu0 %v2902_v10 }
 0x15b   :  { %1757 = vmatmul.mubr.bf16.gmra.mrb[44].mxu1 %v2903_v21  ;;  %1893 = vmatprep.mubr.bf16.mxu0 %v2904_v32 }
 0x15c   :  { %1764 = vmatprep.mubr.bf16.mxu1 %v2906_v55 }
 0x162   :  { %1894 = vmatmul.mubr.bf16.gmra.mrb[56].mxu0 %v2908_v41  ;;  %v4076_v41 = vpop.permute.xlu0 %1218 }
 0x163   :  { %1765 = vmatmul.mubr.bf16.gmra.mrb[48].mxu1 %v2909_v50  ;;  %1901 = vmatprep.mubr.bf16.mxu0 %v2910_v42  ;;  %v4078_v42 = vpop.permute.xlu1 %1223 }
 0x164   :  { %1772 = vmatprep.mubr.bf16.mxu1 %v2912_v30 }
 0x16a   :  { %1902 = vmatmul.mubr.bf16.gmra.mrb[60].mxu0 %v2914_v46 }
 0x16b   :  { %1773 = vmatmul.mubr.bf16.gmra.mrb[52].mxu1 %v2915_v14  ;;  %1909 = vmatprep.mubr.bf16.mxu0 %v2916_v62  ;;  %v4080_v14 = vpop.permute.xlu0 %1308 }
 0x16c   :  { %1780 = vmatprep.mubr.bf16.mxu1 %v2918_v17 }
 0x172   :  { %1910 = vmatmul.mubr.bf16.gmra.mrb[64].mxu0 %v2920_v18  ;;  %v4082_v18 = vpop.permute.xlu1 %1313 }
 0x173   :  { %1781 = vmatmul.mubr.bf16.gmra.mrb[56].mxu1 %v2921_v48  ;;  %1917 = vmatprep.mubr.bf16.mxu0 %v2922_v20 }
 0x174   :  { %1788 = vmatprep.mubr.bf16.mxu1 %v2924_v49  ;;  %v4084_v49 = vpop.permute.xlu0 %1228 }
 0x17a   :  { %1918 = vmatmul.mubr.bf16.gmra.mrb[68].mxu0 %v2926_v27 }
 0x17b   :  { %1789 = vmatmul.mubr.bf16.gmra.mrb[60].mxu1 %v2927_v61  ;;  %1925 = vmatprep.mubr.bf16.mxu0 %v2928_v43  ;;  %v4086_v61 = vpop.permute.xlu1 %1233 }
 0x17c   :  { %1796 = vmatprep.mubr.bf16.mxu1 %v2930_v26 }
 0x182   :  { %1926 = vmatmul.mubr.bf16.gmra.mrb[72].mxu0 %v2932_v19 }
 0x183   :  { %1797 = vmatmul.mubr.bf16.gmra.mrb[64].mxu1 %v2933_v2  ;;  %1933 = vmatprep.mubr.bf16.mxu0 %v2934_v51 }
 0x184   :  { %1804 = vmatprep.mubr.bf16.mxu1 %v2936_v15  ;;  %v4092_v15 = vpop.permute.xlu0 %1318 }
 0x18a   :  { %1934 = vmatmul.mubr.bf16.gmra.mrb[76].mxu0 %v2938_v57  ;;  %v4094_v57 = vpop.permute.xlu1 %1323 }
 0x18b   :  { %1805 = vmatmul.mubr.bf16.gmra.mrb[68].mxu1 %v2939_v47  ;;  %1941 = vmatprep.mubr.bf16.mxu0 %v2940_v38 }
 0x18c   :  { %1812 = vmatprep.mubr.bf16.mxu1 %v2942_v6 }
 0x192   :  { %1942 = vmatmul.mubr.bf16.gmra.mrb[80].mxu0 %v2944_v35 }
 0x193   :  { %1813 = vmatmul.mubr.bf16.gmra.mrb[72].mxu1 %v2945_v33  ;;  %1949 = vmatprep.mubr.bf16.mxu0 %v2946_v39 }
 0x194   :  { %1820 = vmatprep.mubr.bf16.mxu1 %v2948_v9 }
 0x19a   :  { %1950 = vmatmul.mubr.bf16.gmra.mrb[84].mxu0 %v2950_v44 }
 0x19b   :  { %1821 = vmatmul.mubr.bf16.gmra.mrb[76].mxu1 %v2951_v1  ;;  %1957 = vmatprep.mubr.bf16.mxu0 %v2952_v4 }
 0x19c   :  { %1828 = vmatprep.mubr.bf16.mxu1 %v2954_v36 }
 0x1a2   :  { %1958 = vmatmul.mubr.bf16.gmra.mrb[88].mxu0 %v2956_v25 }
 0x1a3   :  { %1829 = vmatmul.mubr.bf16.gmra.mrb[80].mxu1 %v2957_v5  ;;  %1965 = vmatprep.mubr.bf16.mxu0 %v2958_v40 }
 0x1aa   :  { %1966 = vmatmul.mubr.bf16.gmra.mrb[92].mxu0 %v2960_v31 }
 0x1ab   :  { %1973 = vmatprep.mubr.bf16.mxu0 %v2961_v24 }
 0x1b2   :  { %1974 = vmatmul.mubr.bf16.gmra.mrb[96].mxu0 %v2963_v63  ;;  %v4104_v63 = vpop.permute.xlu0 %1238 }
 0x1b3   :  { %1981 = vmatprep.mubr.bf16.mxu0 %v2964_v16  ;;  %v2972_v16 = vld [vmem:[%s4350_s6 + $0x4] ss:$8 sps:$4 sm:$0xff]  }
 0x1b4   :  { %2158 = vmatprep.mubr.bf16.mxu1 %v2972_v16 }
 0x1ba   :  { %1982 = vmatmul.mubr.bf16.gmra.mrb[100].mxu0 %v2966_v28  ;;  %v4109_v28 = vpop.permute.xlu1 %1243 }
 0x1bb   :  { %1989 = vmatprep.mubr.bf16.mxu0 %v2967_v29 }
 0x1c2   :  { %1990 = vmatmul.mubr.bf16.gmra.mrb[104].mxu0 %v2969_v37 }
 0x1fe   :  { %v2500_v11 = vpop.f32.mrb[20].mxu1 }
 0x1ff   :  { %v2501_v45 = vpop.f32.mrb[21].mxu1 }
 0x200   :  { %v2502_v23 = vadd.f32 %v2501_v45, %v2500_v11  ;;  %v2503_v34 = vpop.f32.mrb[22].mxu1 }
 0x201   :  { %v2504_v58 = vpop.f32.mrb[23].mxu1 }
 0x202   :  { %v2505_v22 = vadd.f32 %v2504_v58, %v2503_v34  ;;  %v1711_v35 = vadd.f32 %v2502_v23, %v1199_v8 }
 0x204   :  { %v1714_v36 = vadd.f32 %v2505_v22, %v1204_v54 }
 0x206   :  { %v2506_v60 = vpop.f32.mrb[24].mxu1 }
 0x207   :  { %v2507_v10 = vpop.f32.mrb[25].mxu1 }
 0x208   :  { %v2508_v21 = vadd.f32 %v2507_v10, %v2506_v60  ;;  %v2509_v32 = vpop.f32.mrb[26].mxu1 }
 0x209   :  { %v2510_v55 = vpop.f32.mrb[27].mxu1 }
 0x20a   :  { %v2511_v50 = vadd.f32 %v2510_v55, %v2509_v32  ;;  %v1719_v11 = vadd.f32 %v2508_v21, %v1209_v59  ;;  %v4124_v59 = vpop.permute.xlu1 %1333 }
 0x20c   :  { %v1722_v10 = vadd.f32 %v2511_v50, %v4070_v52 }
 0x20e   :  { %v2512_v30 = vpop.f32.mrb[28].mxu1 }
 0x20f   :  { %v2513_v46 = vpop.f32.mrb[29].mxu1 }
 0x210   :  { %v2514_v62 = vadd.f32 %v2513_v46, %v2512_v30  ;;  %v2515_v17 = vpop.f32.mrb[30].mxu1 }
 0x211   :  { %v2516_v48 = vpop.f32.mrb[31].mxu1 }
 0x212   :  { %v2517_v20 = vadd.f32 %v2516_v48, %v2515_v17  ;;  %v4122_v48 = vpop.permute.xlu0 %1328  ;;  %v1727_v52 = vadd.f32 %v2514_v62, %v4076_v41 }
 0x216   :  { %v2518_v27 = vpop.f32.mrb[32].mxu1 }
 0x217   :  { %v2519_v43 = vpop.f32.mrb[33].mxu1 }
 0x218   :  { %v4088_v26 = vadd.f32 %v2519_v43, %v2518_v27  ;;  %v2521_v19 = vpop.f32.mrb[34].mxu1 }
 0x219   :  { %v2522_v2 = vpop.f32.mrb[35].mxu1 }
 0x21a   :  { %v4090_v51 = vadd.f32 %v2522_v2, %v2521_v19 }
 0x21d   :  { %v2612_v47 = vpop.f32.mrb[44].mxu0 }
 0x21e   :  { %v2524_v38 = vpop.f32.mrb[36].mxu1  ;;  %v2613_v6 = vpop.f32.mrb[45].mxu0 }
 0x21f   :  { %v2614_v33 = vadd.f32 %v2613_v6, %v2612_v47  ;;  %v2525_v39 = vpop.f32.mrb[37].mxu1  ;;  %v2615_v9 = vpop.f32.mrb[46].mxu0 }
 0x220   :  { %v4096_v44 = vadd.f32 %v2525_v39, %v2524_v38  ;;  %v2527_v1 = vpop.f32.mrb[38].mxu1  ;;  %v2616_v4 = vpop.f32.mrb[47].mxu0 }
 0x221   :  { %v4098_v25 = vadd.f32 %v2614_v33, %v1711_v35  ;;  %v2617_v5 = vadd.f32 %v2616_v4, %v2615_v9  ;;  %v2528_v40 = vpop.f32.mrb[39].mxu1  ;;  %v1730_v33 = vadd.f32 %v2517_v20, %v4078_v42 }
 0x222   :  { %v4100_v31 = vadd.f32 %v2528_v40, %v2527_v1  ;;  %v1254_v40 = vpop.permute.xlu1 %1253 }
 0x223   :  { %v4102_v24 = vadd.f32 %v2617_v5, %v1714_v36  ;;  %v1249_v5 = vpop.permute.xlu0 %1248 }
 0x225   :  { %v1998_v29 = vpack.c.bf16 %v4102_v24, %v4098_v25  ;;  %v2618_v37 = vpop.f32.mrb[48].mxu0 }
 0x226   :  { %v2530_v8 = vpop.f32.mrb[40].mxu1  ;;  %v2619_v54 = vpop.f32.mrb[49].mxu0 }
 0x227   :  { %v2620_v45 = vadd.f32 %v2619_v54, %v2618_v37  ;;  %v2531_v23 = vpop.f32.mrb[41].mxu1  ;;  %v2621_v34 = vpop.f32.mrb[50].mxu0 }
 0x228   :  { %v4113_v58 = vadd.f32 %v2531_v23, %v2530_v8  ;;  %v2533_v22 = vpop.f32.mrb[42].mxu1  ;;  %v2622_v60 = vpop.f32.mrb[51].mxu0  ;;  %v1735_v8 = vadd.f32 %v4088_v26, %v4084_v49 }
 0x229   :  { %v4116_v32 = vadd.f32 %v2620_v45, %v1719_v11  ;;  %v2623_v55 = vadd.f32 %v2622_v60, %v2621_v34  ;;  %v2534_v30 = vpop.f32.mrb[43].mxu1  ;;  %v1738_v34 = vadd.f32 %v4090_v51, %v4086_v61  ;;  %v4154_v49 = vpop.permute.xlu1 %1343  ;;  %v1743_v61 = vadd.f32 %v4096_v44, %v4104_v63 }
 0x22a   :  { %v4118_v46 = vadd.f32 %v2534_v30, %v2533_v22 }
 0x22b   :  { %v4120_v17 = vadd.f32 %v2623_v55, %v1722_v10 }
 0x22d   :  { %v1999_v21 = vpack.c.bf16 %v4120_v17, %v4116_v32  ;;  %v2624_v27 = vpop.f32.mrb[52].mxu0  ;;  %v1264_v44 = vpop.permute.xlu1 %1263 }
 0x22e   :  { %v2536_v43 = vpop.f32.mrb[44].mxu1  ;;  %v2625_v19 = vpop.f32.mrb[53].mxu0 }
 0x22f   :  { %v2626_v50 = vadd.f32 %v2625_v19, %v2624_v27  ;;  %v2537_v2 = vpop.f32.mrb[45].mxu1  ;;  %v2627_v47 = vpop.f32.mrb[54].mxu0 }
 0x230   :  { %v4129_v38 = vadd.f32 %v2537_v2, %v2536_v43  ;;  %v2539_v6 = vpop.f32.mrb[46].mxu1  ;;  %v2628_v35 = vpop.f32.mrb[55].mxu0 }
 0x231   :  { %v4132_v39 = vadd.f32 %v2626_v50, %v1727_v52  ;;  %v2629_v9 = vadd.f32 %v2628_v35, %v2627_v47  ;;  %v2540_v1 = vpop.f32.mrb[47].mxu1  ;;  %v4152_v27 = vpop.permute.xlu0 %1338 }
 0x232   :  { %v4134_v4 = vadd.f32 %v2540_v1, %v2539_v6 }
 0x233   :  { %v4136_v36 = vadd.f32 %v2629_v9, %v1730_v33  ;;  %v1746_v33 = vadd.f32 %v4100_v31, %v4109_v28 }
 0x235   :  { %v2000_v41 = vpack.c.bf16 %v4136_v36, %v4132_v39  ;;  %v2630_v62 = vpop.f32.mrb[56].mxu0 }
 0x236   :  { %v2542_v16 = vpop.f32.mrb[48].mxu1  ;;  %v2631_v37 = vpop.f32.mrb[57].mxu0 }
 0x237   :  { %v2632_v42 = vadd.f32 %v2631_v37, %v2630_v62  ;;  %v2543_v20 = vpop.f32.mrb[49].mxu1  ;;  %v2633_v54 = vpop.f32.mrb[58].mxu0 }
 0x238   :  { %v4142_v11 = vadd.f32 %v2543_v20, %v2542_v16  ;;  %v2545_v45 = vpop.f32.mrb[50].mxu1  ;;  %v2634_v23 = vpop.f32.mrb[59].mxu0 }
 0x239   :  { %v4146_v22 = vadd.f32 %v2632_v42, %v1735_v8  ;;  %v2635_v60 = vadd.f32 %v2634_v23, %v2633_v54  ;;  %v2546_v10 = vpop.f32.mrb[51].mxu1  ;;  %v1259_v8 = vpop.permute.xlu0 %1258 }
 0x23a   :  { %v4148_v55 = vadd.f32 %v2546_v10, %v2545_v45  ;;  %v1751_v45 = vadd.f32 %v4113_v58, %v1249_v5  ;;  %v4184_v58 = vpop.permute.xlu1 %1353 }
 0x23b   :  { %v4150_v30 = vadd.f32 %v2635_v60, %v1738_v34 }
 0x23d   :  { %v2001_v26 = vpack.c.bf16 %v4150_v30, %v4146_v22  ;;  %v2636_v43 = vpop.f32.mrb[60].mxu0 }
 0x23e   :  { %v2548_v19 = vpop.f32.mrb[52].mxu1  ;;  %v2637_v52 = vpop.f32.mrb[61].mxu0 }
 0x23f   :  { %v2638_v51 = vadd.f32 %v2637_v52, %v2636_v43  ;;  %v2549_v50 = vpop.f32.mrb[53].mxu1  ;;  %v2639_v2 = vpop.f32.mrb[62].mxu0  ;;  %v1754_v43 = vadd.f32 %v4118_v46, %v1254_v40  ;;  %v1759_v46 = vadd.f32 %v4129_v38, %v1259_v8 }
 0x240   :  { %v4160_v47 = vadd.f32 %v2549_v50, %v2548_v19  ;;  %v2551_v6 = vpop.f32.mrb[54].mxu1  ;;  %v2640_v35 = vpop.f32.mrb[63].mxu0 }
 0x241   :  { %v4164_v9 = vadd.f32 %v2638_v51, %v1743_v61  ;;  %v2641_v1 = vadd.f32 %v2640_v35, %v2639_v2  ;;  %v2552_v62 = vpop.f32.mrb[55].mxu1  ;;  %v4182_v2 = vpop.permute.xlu0 %1348 }
 0x242   :  { %v4166_v16 = vadd.f32 %v2552_v62, %v2551_v6 }
 0x243   :  { %v4168_v37 = vadd.f32 %v2641_v1, %v1746_v33 }
 0x245   :  { %v2642_v42 = vpop.f32.mrb[64].mxu0  ;;  %v4411_v30 = vpack.c.bf16 %v4168_v37, %v4164_v9 }
 0x246   :  { %v2554_v20 = vpop.f32.mrb[56].mxu1  ;;  %v2643_v54 = vpop.f32.mrb[65].mxu0 }
 0x247   :  { %v2644_v23 = vadd.f32 %v2643_v54, %v2642_v42  ;;  %v2555_v31 = vpop.f32.mrb[57].mxu1  ;;  %v2645_v28 = vpop.f32.mrb[66].mxu0 }
 0x248   :  { %v4173_v34 = vadd.f32 %v2555_v31, %v2554_v20  ;;  %v2557_v60 = vpop.f32.mrb[58].mxu1  ;;  %v2646_v10 = vpop.f32.mrb[67].mxu0 }
 0x249   :  { %v4176_v19 = vadd.f32 %v2644_v23, %v1751_v45  ;;  %v2647_v52 = vadd.f32 %v2646_v10, %v2645_v28  ;;  %v2558_v61 = vpop.f32.mrb[59].mxu1  ;;  %v1762_v45 = vadd.f32 %v4134_v4, %v1264_v44 }
 0x24a   :  { %v4178_v51 = vadd.f32 %v2558_v61, %v2557_v60 }
 0x24b   :  { %v4180_v50 = vadd.f32 %v2647_v52, %v1754_v43  ;;  %v1269_v43 = vpop.permute.xlu0 %1268  ;;  %v1274_v52 = vpop.permute.xlu1 %1273 }
 0x24d   :  { %v2648_v6 = vpop.f32.mrb[68].mxu0  ;;  %v4412_v37 = vpack.c.bf16 %v4180_v50, %v4176_v19 }
 0x24e   :  { %v2560_v35 = vpop.f32.mrb[60].mxu1  ;;  %v2649_v33 = vpop.f32.mrb[69].mxu0 }
 0x24f   :  { %v2650_v40 = vadd.f32 %v2649_v33, %v2648_v6  ;;  %v2561_v1 = vpop.f32.mrb[61].mxu1  ;;  %v2651_v62 = vpop.f32.mrb[70].mxu0 }
 0x250   :  { %v4189_v42 = vadd.f32 %v2561_v1, %v2560_v35  ;;  %v2563_v20 = vpop.f32.mrb[62].mxu1  ;;  %v2652_v54 = vpop.f32.mrb[71].mxu0  ;;  %v1767_v35 = vadd.f32 %v4142_v11, %v1269_v43 }
 0x251   :  { %v4192_v23 = vadd.f32 %v2650_v40, %v1759_v46  ;;  %v2653_v31 = vadd.f32 %v2652_v54, %v2651_v62  ;;  %v2564_v28 = vpop.f32.mrb[63].mxu1  ;;  %v1770_v62 = vadd.f32 %v4148_v55, %v1274_v52 }
 0x252   :  { %v4194_v60 = vadd.f32 %v2564_v28, %v2563_v20 }
 0x253   :  { %v4196_v10 = vadd.f32 %v2653_v31, %v1762_v45 }
 0x255   :  { %v2654_v8 = vpop.f32.mrb[72].mxu0  ;;  %v4413_v50 = vpack.c.bf16 %v4196_v10, %v4192_v23  ;;  %v2970_v23 = vld [vmem:[%s4350_s6] ss:$8 sps:$4 sm:$0xff]   ;;  %v2975_v10 = vld [vmem:[%s4350_s6 + $0x10] ss:$8 sps:$4 sm:$0xff]  }
 0x256   :  { %v2566_v61 = vpop.f32.mrb[64].mxu1  ;;  %v2655_v6 = vpop.f32.mrb[73].mxu0 }
 0x257   :  { %v2656_v33 = vadd.f32 %v2655_v6, %v2654_v8  ;;  %v2567_v4 = vpop.f32.mrb[65].mxu1  ;;  %v2657_v44 = vpop.f32.mrb[74].mxu0 }
 0x258   :  { %v4201_v46 = vadd.f32 %v2567_v4, %v2566_v61  ;;  %v2569_v40 = vpop.f32.mrb[66].mxu1  ;;  %v2658_v1 = vpop.f32.mrb[75].mxu0  ;;  %v1775_v61 = vadd.f32 %v4160_v47, %v4062_v56  ;;  %v1783_v47 = vadd.f32 %v4173_v34, %v4066_v0 }
 0x259   :  { %v4204_v20 = vadd.f32 %v2656_v33, %v1767_v35  ;;  %v2659_v54 = vadd.f32 %v2658_v1, %v2657_v44  ;;  %v2570_v45 = vpop.f32.mrb[67].mxu1  ;;  %v1778_v44 = vadd.f32 %v4166_v16, %v4064_v7  ;;  %v2014_v7 = vmax.bf16 %v4375_v3, %v1998_v29 }
 0x25a   :  { %v4206_v31 = vadd.f32 %v2570_v45, %v2569_v40  ;;  %v1791_v29 = vadd.f32 %v4189_v42, %v4072_v12 }
 0x25b   :  { %v4208_v28 = vadd.f32 %v2659_v54, %v1770_v62 }
 0x25d   :  { %v2660_v43 = vpop.f32.mrb[76].mxu0 }
 0x25e   :  { %v2572_v8 = vpop.f32.mrb[68].mxu1  ;;  %v2661_v6 = vpop.f32.mrb[77].mxu0 }
 0x25f   :  { %v2662_v4 = vadd.f32 %v2661_v6, %v2660_v43  ;;  %v2573_v38 = vpop.f32.mrb[69].mxu1  ;;  %v2663_v55 = vpop.f32.mrb[78].mxu0 }
 0x260   :  { %v4214_v52 = vadd.f32 %v2573_v38, %v2572_v8  ;;  %v2575_v35 = vpop.f32.mrb[70].mxu1  ;;  %v2664_v33 = vpop.f32.mrb[79].mxu0 }
 0x261   :  { %v1936_v40 = vadd.f32 %v2662_v4, %v1775_v61  ;;  %v2665_v1 = vadd.f32 %v2664_v33, %v2663_v55  ;;  %v2576_v62 = vpop.f32.mrb[71].mxu1  ;;  %v1786_v55 = vadd.f32 %v4178_v51, %v4068_v13  ;;  %v2015_v51 = vmax.bf16 %v4375_v3, %v1999_v21 }
 0x262   :  { %v4218_v54 = vadd.f32 %v2576_v62, %v2575_v35  ;;  %v1799_v21 = vadd.f32 %v4201_v46, %v4080_v14  ;;  %v1807_v39 = vadd.f32 %v4214_v52, %v4092_v15 }
 0x263   :  { %v1939_v45 = vadd.f32 %v2665_v1, %v1778_v44 }
 0x265   :  { %v2006_v11 = vpack.c.bf16 %v1939_v45, %v1936_v40  ;;  %v2666_v5 = vpop.f32.mrb[80].mxu0 }
 0x266   :  { %v2578_v63 = vpop.f32.mrb[72].mxu1  ;;  %v2667_v56 = vpop.f32.mrb[81].mxu0 }
 0x267   :  { %v2668_v38 = vadd.f32 %v2667_v56, %v2666_v5  ;;  %v2579_v43 = vpop.f32.mrb[73].mxu1  ;;  %v2669_v8 = vpop.f32.mrb[82].mxu0  ;;  %v2022_v6 = vmax.bf16 %v4375_v3, %v2006_v11 }
 0x268   :  { %v4227_v16 = vadd.f32 %v2579_v43, %v2578_v63  ;;  %v2581_v61 = vpop.f32.mrb[74].mxu1  ;;  %v2670_v4 = vpop.f32.mrb[83].mxu0 }
 0x269   :  { %v1944_v35 = vadd.f32 %v2668_v38, %v1783_v47  ;;  %v2671_v33 = vadd.f32 %v2670_v4, %v2669_v8  ;;  %v2582_v0 = vpop.f32.mrb[75].mxu1  ;;  %2708 = vmatprep.subr.bf16.mxu1 %v2022_v6  ;;  %v1794_v47 = vadd.f32 %v4194_v60, %v4074_v53  ;;  %v2016_v60 = vmax.bf16 %v4375_v3, %v2000_v41 }
 0x26a   :  { %v4231_v34 = vadd.f32 %v2582_v0, %v2581_v61  ;;  %2709 = vmatpush3.bf16.msra.mxu1 %v2014_v7 }
 0x26b   :  { %v1947_v5 = vadd.f32 %v2671_v33, %v1786_v55 }
 0x26d   :  { %v2007_v11 = vpack.c.bf16 %v1947_v5, %v1944_v35  ;;  %v2672_v44 = vpop.f32.mrb[84].mxu0  ;;  %v1802_v5 = vadd.f32 %v4206_v31, %v4082_v18  ;;  %v2017_v18 = vmax.bf16 %v4375_v3, %v2001_v26 }
 0x26e   :  { %v2584_v25 = vpop.f32.mrb[76].mxu1  ;;  %v2673_v24 = vpop.f32.mrb[85].mxu0 }
 0x26f   :  { %v2674_v63 = vadd.f32 %v2673_v24, %v2672_v44  ;;  %v2585_v40 = vpop.f32.mrb[77].mxu1  ;;  %v2675_v1 = vpop.f32.mrb[86].mxu0  ;;  %v2023_v13 = vmax.bf16 %v4375_v3, %v2007_v11 }
 0x270   :  { %v4240_v62 = vadd.f32 %v2585_v40, %v2584_v25  ;;  %v2587_v45 = vpop.f32.mrb[78].mxu1  ;;  %v2676_v56 = vpop.f32.mrb[87].mxu0 }
 0x271   :  { %v1952_v38 = vadd.f32 %v2674_v63, %v1791_v29  ;;  %v2677_v43 = vadd.f32 %v2676_v56, %v2675_v1  ;;  %v2588_v12 = vpop.f32.mrb[79].mxu1  ;;  %2710 = vmatprep.subr.bf16.mxu1 %v2023_v13  ;;  %v1810_v1 = vadd.f32 %v4218_v54, %v4094_v57  ;;  %v2018_v57 = vmax.bf16 %v4375_v3, %v4411_v30 }
 0x272   :  { %v4244_v42 = vadd.f32 %v2588_v12, %v2587_v45  ;;  %2711 = vmatpush3.bf16.msra.mxu1 %v2015_v51  ;;  %v1818_v54 = vadd.f32 %v4231_v34, %v4124_v59  ;;  %v2019_v59 = vmax.bf16 %v4375_v3, %v4412_v37 }
 0x273   :  { %v1955_v8 = vadd.f32 %v2677_v43, %v1794_v47  ;;  %v1815_v47 = vadd.f32 %v4227_v16, %v4122_v48 }
 0x275   :  { %v2008_v6 = vpack.c.bf16 %v1955_v8, %v1952_v38  ;;  %v2678_v7 = vpop.f32.mrb[88].mxu0 }
 0x276   :  { %v2590_v32 = vpop.f32.mrb[80].mxu1  ;;  %v2679_v17 = vpop.f32.mrb[89].mxu0 }
 0x277   :  { %v2680_v61 = vadd.f32 %v2679_v17, %v2678_v7  ;;  %v2591_v4 = vpop.f32.mrb[81].mxu1  ;;  %v2681_v55 = vpop.f32.mrb[90].mxu0  ;;  %v2024_v53 = vmax.bf16 %v4375_v3, %v2008_v6 }
 0x278   :  { %v2592_v35 = vadd.f32 %v2591_v4, %v2590_v32  ;;  %v2593_v33 = vpop.f32.mrb[82].mxu1  ;;  %v2682_v0 = vpop.f32.mrb[91].mxu0  ;;  %v1823_v32 = vadd.f32 %v4240_v62, %v4152_v27 }
 0x279   :  { %v1960_v11 = vadd.f32 %v2680_v61, %v1799_v21  ;;  %v2683_v44 = vadd.f32 %v2682_v0, %v2681_v55  ;;  %v2594_v25 = vpop.f32.mrb[83].mxu1  ;;  %2712 = vmatprep.subr.bf16.mxu1 %v2024_v53  ;;  %v1826_v61 = vadd.f32 %v4244_v42, %v4154_v49 }
 0x27a   :  { %v2595_v14 = vadd.f32 %v2594_v25, %v2593_v33  ;;  %2713 = vmatpush3.bf16.msra.mxu1 %v2016_v60  ;;  %v1831_v33 = vadd.f32 %v2592_v35, %v4182_v2  ;;  %v4414_v35 = vpack.c.bf16 %v4208_v28, %v4204_v20  ;;  %v2976_v20 = vld [vmem:[%s4350_s6 + $0x24] ss:$8 sps:$4 sm:$0xff]   ;;  %v2978_v28 = vld [vmem:[%s4350_s6 + $0x20] ss:$8 sps:$4 sm:$0xff]  }
 0x27b   :  { %v1963_v46 = vadd.f32 %v2683_v44, %v1802_v5 }
 0x27c   :  { %v1834_v42 = vadd.f32 %v2595_v14, %v4184_v58  ;;  %v2973_v58 = vld [vmem:[%s4350_s6 + $0x14] ss:$8 sps:$4 sm:$0xff]  }
 0x27d   :  { %v2009_v24 = vpack.c.bf16 %v1963_v46, %v1960_v11  ;;  %v2684_v29 = vpop.f32.mrb[92].mxu0  ;;  %v2020_v11 = vmax.bf16 %v4375_v3, %v4413_v50  ;;  %v2979_v14 = vld [vmem:[%s4350_s6 + $0x34] ss:$8 sps:$4 sm:$0xff]  }
 0x27e   :  { %v2685_v63 = vpop.f32.mrb[93].mxu0 }
 0x27f   :  { %v2686_v36 = vadd.f32 %v2685_v63, %v2684_v29  ;;  %v2687_v41 = vpop.f32.mrb[94].mxu0  ;;  %v2025_v40 = vmax.bf16 %v4375_v3, %v2009_v24  ;;  %v2021_v29 = vmax.bf16 %v4375_v3, %v4414_v35  ;;  %v2981_v63 = vld [vmem:[%s4350_s6 + $0x30] ss:$8 sps:$4 sm:$0xff]  }
 0x280   :  { %v2688_v31 = vpop.f32.mrb[95].mxu0 }
 0x281   :  { %v1968_v13 = vadd.f32 %v2686_v36, %v1807_v39  ;;  %v2689_v51 = vadd.f32 %v2688_v31, %v2687_v41  ;;  %2714 = vmatprep.subr.bf16.mxu1 %v2025_v40  ;;  %v3003_v39 = vmov 0.0  }
 0x282   :  { %2715 = vmatpush3.bf16.msra.mxu1 %v2017_v18 }
 0x283   :  { %v1971_v45 = vadd.f32 %v2689_v51, %v1810_v1  ;;  %v2054_v51 = vpop.permute.xlu1 %2053 }
 0x285   :  { %v2010_v56 = vpack.c.bf16 %v1971_v45, %v1968_v13  ;;  %v2690_v15 = vpop.f32.mrb[96].mxu0  ;;  %v2049_v13 = vpop.permute.xlu0 %2048 }
 0x286   :  { %v2691_v52 = vpop.f32.mrb[97].mxu0 }
 0x287   :  { %v2692_v38 = vadd.f32 %v2691_v52, %v2690_v15  ;;  %v2693_v43 = vpop.f32.mrb[98].mxu0  ;;  %v2026_v22 = vmax.bf16 %v4375_v3, %v2010_v56 }
 0x288   :  { %v2694_v26 = vpop.f32.mrb[99].mxu0 }
 0x289   :  { %v1976_v12 = vadd.f32 %v2692_v38, %v1815_v47  ;;  %v2695_v8 = vadd.f32 %v2694_v26, %v2693_v43  ;;  %2716 = vmatprep.subr.bf16.mxu1 %v2026_v22  ;;  %v2059_v26 = vpop.permute.xlu0 %2058 }
 0x28a   :  { %2717 = vmatpush3.bf16.msra.mxu1 %v2018_v57 }
 0x28b   :  { %v1979_v6 = vadd.f32 %v2695_v8, %v1818_v54  ;;  %v2064_v54 = vpop.permute.xlu1 %2063 }
 0x28d   :  { %v2011_v7 = vpack.c.bf16 %v1979_v6, %v1976_v12  ;;  %v2696_v48 = vpop.f32.mrb[100].mxu0  ;;  %v2069_v37 = vpop.permute.xlu0 %2068 }
 0x28e   :  { %v2697_v16 = vpop.f32.mrb[101].mxu0 }
 0x28f   :  { %v2698_v17 = vadd.f32 %v2697_v16, %v2696_v48  ;;  %v2699_v21 = vpop.f32.mrb[102].mxu0  ;;  %v2027_v9 = vmax.bf16 %v4375_v3, %v2011_v7 }
 0x290   :  { %v2700_v34 = vpop.f32.mrb[103].mxu0 }
 0x291   :  { %v1984_v4 = vadd.f32 %v2698_v17, %v1823_v32  ;;  %v2701_v55 = vadd.f32 %v2700_v34, %v2699_v21  ;;  %2718 = vmatprep.subr.bf16.mxu1 %v2027_v9 }
 0x292   :  { %2719 = vmatpush3.bf16.msra.mxu1 %v2019_v59  ;;  %v2074_v59 = vpop.permute.xlu1 %2073 }
 0x293   :  { %v1987_v53 = vadd.f32 %v2701_v55, %v1826_v61 }
 0x295   :  { %v2012_v60 = vpack.c.bf16 %v1987_v53, %v1984_v4  ;;  %v2702_v27 = vpop.f32.mrb[104].mxu0 }
 0x296   :  { %v2703_v62 = vpop.f32.mrb[105].mxu0 }
 0x297   :  { %v2704_v0 = vadd.f32 %v2703_v62, %v2702_v27  ;;  %v2705_v5 = vpop.f32.mrb[106].mxu0  ;;  %v2028_v19 = vmax.bf16 %v4375_v3, %v2012_v60 }
 0x298   :  { %v2706_v49 = vpop.f32.mrb[107].mxu0 }
 0x299   :  { %v1992_v44 = vadd.f32 %v2704_v0, %v1831_v33  ;;  %v2707_v25 = vadd.f32 %v2706_v49, %v2705_v5  ;;  %2720 = vmatprep.subr.bf16.mxu1 %v2028_v19  ;;  %v2079_v5 = vpop.permute.xlu0 %2078  ;;  %v2084_v19 = vpop.permute.xlu1 %2083 }
 0x29a   :  { %2721 = vmatpush3.bf16.msra.mxu1 %v2020_v11 }
 0x29b   :  { %v1995_v46 = vadd.f32 %v2707_v25, %v1834_v42 }
 0x29d   :  { %v2013_v24 = vpack.c.bf16 %v1995_v46, %v1992_v44  ;;  %v2199_v44 = vld [vmem:[%s4351_s8] sm:$0xf]  ;;  %v2204_v25 = vpop.permute.xlu0 %2203 }
 0x29f   :  { %v2029_v2 = vmax.bf16 %v4375_v3, %v2013_v24 }
 0x2a1   :  { %2722 = vmatprep.subr.bf16.mxu1 %v2029_v2 }
 0x2a2   :  { %2723 = vmatpush3.bf16.msra.mxu1 %v2021_v29 }
 0x2a3   :  { %2821 = vmatprep.subr.bf16.mxu1 %v3003_v39 }
 0x2a5   :  { %2159 = vmatmul.mubr.bf16.vlgmr.msra.gmra.mrb[84].mxu1 %v2970_v23 }
 0x2a6   :  { %2166 = vmatprep.mubr.bf16.mxu1 %v2973_v58 }
 0x2ad   :  { %2167 = vmatmul.mubr.bf16.gmra.mrb[88].mxu1 %v2975_v10 }
 0x2ae   :  { %2174 = vmatprep.mubr.bf16.mxu1 %v2976_v20 }
 0x2b5   :  { %2175 = vmatmul.mubr.bf16.gmra.mrb[92].mxu1 %v2978_v28 }
 0x2b6   :  { %2182 = vmatprep.mubr.bf16.mxu1 %v2979_v14 }
 0x2bd   :  { %2183 = vmatmul.mubr.bf16.gmra.mrb[96].mxu1 %v2981_v63 }
 0x2be   :  { %2829 = vmatprep.mubr.msk.bf16.mxu1 %vm3004_vm1, %v3003_v39 }
 0x378   :  { %v2724_v36 = vpop.f32.mrb[84].mxu1 }
 0x379   :  { %v2725_v41 = vpop.f32.mrb[85].mxu1 }
 0x37a   :  { %v2726_v40 = vadd.f32 %v2725_v41, %v2724_v36  ;;  %v2727_v18 = vpop.f32.mrb[86].mxu1 }
 0x37b   :  { %v2728_v31 = vpop.f32.mrb[87].mxu1 }
 0x37c   :  { %v2729_v1 = vadd.f32 %v2728_v31, %v2727_v18  ;;  %v2161_v45 = vadd.f32 %v2726_v40, %v2049_v13 }
 0x37e   :  { %v2164_v56 = vadd.f32 %v2729_v1, %v2054_v51 }
 0x380   :  { %v2191_v15 = vpack.c.bf16 %v2164_v56, %v2161_v45  ;;  %v2730_v52 = vpop.f32.mrb[88].mxu1 }
 0x381   :  { %v2731_v47 = vpop.f32.mrb[89].mxu1 }
 0x382   :  { %v2195_v38 = vmax.bf16 %v4375_v3, %v2191_v15  ;;  %v2732_v43 = vadd.f32 %v2731_v47, %v2730_v52  ;;  %v2733_v22 = vpop.f32.mrb[90].mxu1 }
 0x383   :  { %v2734_v30 = vpop.f32.mrb[91].mxu1 }
 0x384   :  { %v2735_v57 = vadd.f32 %v2734_v30, %v2733_v22  ;;  %2822 = vmatpush3.bf16.msra.mxu1 %v2195_v38  ;;  %v2169_v12 = vadd.f32 %v2732_v43, %v2059_v26  ;;  %v2264_v22 = vld [vmem:[%s4353_s1] sm:$0x3] }
 0x385   :  { %2823 = vmatprep.subr.bf16.mxu1 %v3003_v39 }
 0x386   :  { %v2172_v8 = vadd.f32 %v2735_v57, %v2064_v54  ;;  %v2265_v57 = vmul.f32 -0.5, %v2264_v22 }
 0x388   :  { %v2192_v6 = vpack.c.bf16 %v2172_v8, %v2169_v12  ;;  %v2736_v7 = vpop.f32.mrb[92].mxu1  ;;  %v2266_v8 = vmul.f32 %v2265_v57, %v2264_v22 }
 0x389   :  { %v2737_v48 = vpop.f32.mrb[93].mxu1 }
 0x38a   :  { %v2196_v16 = vmax.bf16 %v4375_v3, %v2192_v6  ;;  %v2738_v32 = vadd.f32 %v2737_v48, %v2736_v7  ;;  %v2739_v17 = vpop.f32.mrb[94].mxu1 }
 0x38b   :  { %v2740_v21 = vpop.f32.mrb[95].mxu1 }
 0x38c   :  { %v2741_v9 = vadd.f32 %v2740_v21, %v2739_v17  ;;  %2824 = vmatpush3.bf16.msra.mxu1 %v2196_v16  ;;  %v2177_v34 = vadd.f32 %v2738_v32, %v2069_v37 }
 0x38d   :  { %2825 = vmatprep.subr.bf16.mxu1 %v3003_v39 }
 0x38e   :  { %v2180_v61 = vadd.f32 %v2741_v9, %v2074_v59 }
 0x390   :  { %v2193_v4 = vpack.c.bf16 %v2180_v61, %v2177_v34  ;;  %v2742_v55 = vpop.f32.mrb[96].mxu1 }
 0x391   :  { %v2743_v53 = vpop.f32.mrb[97].mxu1 }
 0x392   :  { %v2197_v60 = vmax.bf16 %v4375_v3, %v2193_v4  ;;  %v2744_v27 = vadd.f32 %v2743_v53, %v2742_v55  ;;  %v2745_v62 = vpop.f32.mrb[98].mxu1 }
 0x393   :  { %v2746_v33 = vpop.f32.mrb[99].mxu1 }
 0x394   :  { %v2747_v0 = vadd.f32 %v2746_v33, %v2745_v62  ;;  %2826 = vmatpush3.bf16.msra.mxu1 %v2197_v60  ;;  %v2185_v50 = vadd.f32 %v2744_v27, %v2079_v5 }
 0x395   :  { %2827 = vmatprep.subr.bf16.mxu1 %v3003_v39 }
 0x396   :  { %v2188_v11 = vadd.f32 %v2747_v0, %v2084_v19 }
 0x398   :  { %v2194_v49 = vpack.c.bf16 %v2188_v11, %v2185_v50 }
 0x39a   :  { %v2198_v42 = vmax.bf16 %v4375_v3, %v2194_v49 }
 0x39c   :  { %2828 = vmatpush3.bf16.msra.mxu1 %v2198_v42 }
 0x39f   :  { %2830 = vmatmul.mubr.msk.bf16.vlgmr.msra.gmra.mrb[100].mxu1 %vm2206_vm2, %v2199_v44 }
 0x472   :  { %v2244_v46 = vpop.f32.mrb[100].mxu1 }
 0x473   :  { %v2245_v24 = vadd.f32 %v2244_v46, %v2204_v25  ;;  %v2831_v2 = vpop.f32.mrb[101].mxu1 }
 0x474   :  { %v2247_v35 = vpop.f32.mrb[102].mxu1 }
 0x475   :  { %vm2250_vm3 = vcmp.gt.f32.partialorder %v2245_v24, 20.0  ;;  %2982 = vtanh.f32 %v2245_v24  ;;  %v2449_v29 = vmul.f32 -1.442695, %v2245_v24  ;;  %v2832_v23 = vpop.f32.mrb[103].mxu1 }
 0x476   :  { %v2251_v58 = vsel %vm2250_vm3, 0.0, %v2245_v24 }
 0x477   :  { %v2252_v10 = vmul.f32 1.442695, %v2251_v58  ;;  %2984 = vpow2.f32 %v2449_v29 }
 0x479   :  { %2986 = vpow2.f32 %v2252_v10 }
 0x47f   :  { %v2983_v3 = vpop.eup %2982 }
 0x480   :  { %2988 = vtanh.f32 %v2983_v3  ;;  %v2295_v20 = vmul.f32 2.5, %v2983_v3 }
 0x481   :  { %v2985_v28 = vpop.eup %2984 }
 0x482   :  { %v2278_v14 = vadd.f32 1.0, %v2985_v28  ;;  %2297 = vst.msk [vmem:[%s4352_s10] sm:$0x1] %vm2296_vm4, %v2295_v20 }
 0x483   :  { %v2987_v63 = vpop.eup %2986 }
 0x484   :  { %v2254_v39 = vadd.f32 1.0, %v2987_v63  ;;  %2990 = vrcp.f32 %v2278_v14  ;;  %v2257_v36 = vmul.f32 -0.5, %v2987_v63  ;;  %v2260_v1 = vand.u32 2147483647, %v2987_v63 }
 0x486   :  { %2992 = vlog2.f32 %v2254_v39  ;;  %v2258_v40 = vadd.f32 1.0, %v2257_v36  ;;  %vm2261_vm6 = vcmp.lt.f32.partialorder %v2260_v1, 0.0004427343 }
 0x488   :  { %v2259_v56 = vmul.f32 %v2987_v63, %v2258_v40 }
 0x48a   :  { %v2989_v41 = vpop.eup %2988 }
 0x48b   :  { %v2282_v18 = vmul.f32 %v2989_v41, %v2989_v41 }
 0x48d   :  { %v2283_v15 = vsub.f32 1.0, %v2282_v18 }
 0x48e   :  { %v2991_v31 = vpop.eup %2990 }
 0x48f   :  { %2994 = vtanh.f32 %v2991_v31  ;;  %v2298_v13 = vmul.f32 0.22, %v2991_v31  ;;  %v2284_v38 = vadd.f32 1e-07, %v2283_v15 }
 0x490   :  { %v2993_v51 = vpop.eup %2992 }
 0x491   :  { %v2256_v45 = vmul.f32 0.6931472, %v2993_v51  ;;  %2300 = vst.msk [vmem:[%s4352_s10] sm:$0x2] %vm2299_vm5, %v2298_v13 }
 0x493   :  { %v2262_v52 = vsel %vm2261_vm6, %v2259_v56, %v2256_v45 }
 0x494   :  { %v2263_v47 = vsel %vm2250_vm3, %v2245_v24, %v2262_v52 }
 0x495   :  { %2996 = vlog2.f32 %v2263_v47 }
 0x496   :  { %2998 = vlog2.f32 %v2284_v38 }
 0x499   :  { %v2995_v43 = vpop.eup %2994 }
 0x49a   :  { %v2288_v30 = vmul.f32 %v2995_v43, %v2995_v43 }
 0x49c   :  { %v2289_v26 = vsub.f32 1.0, %v2288_v30 }
 0x49e   :  { %v2290_v54 = vadd.f32 1e-07, %v2289_v26 }
 0x49f   :  { %v2997_v12 = vpop.eup %2996 }
 0x4a0   :  { %v2268_v6 = vmul.f32 0.6931472, %v2997_v12  ;;  %3000 = vlog2.f32 %v2290_v54  ;;  %v2999_v48 = vpop.eup %2998 }
 0x4a1   :  { %v2286_v17 = vmul.f32 0.6931472, %v2999_v48 }
 0x4a2   :  { %v2270_v7 = vrot.slane %v2268_v6, 2 }
 0x4a4   :  { %v2272_v16 = vsub.f32 %v2266_v8, %v2270_v7 }
 0x4a6   :  { %v2448_v32 = vadd.f32 -0.9189385, %v2272_v16 }
 0x4a8   :  { %v2293_v21 = vsub.f32 %v2448_v32, %v2286_v17 }
 0x4aa   :  { %v3001_v9 = vpop.eup %3000  ;;  %v2301_v37 = vmax.f32 %v2293_v21, -20.0 }
 0x4ab   :  { %v2292_v59 = vmul.f32 0.6931472, %v3001_v9 }
 0x4ac   :  { %v2302_v34 = vmin.f32 %v2301_v37, 2.0 }
 0x4ad   :  { %v2294_v61 = vsub.f32 %v2448_v32, %v2292_v59 }
 0x4ae   :  { %2303 = vst.msk [vmem:[%s4352_s10 + $0x2] sm:$0x1] %vm2296_vm4, %v2302_v34 }
 0x4af   :  { %v2304_v4 = vmax.f32 %v2294_v61, -20.0 }
 0x4b1   :  { %v2305_v55 = vmin.f32 %v2304_v4, 2.0 }
 0x4b3   :  { %2306 = vst.msk [vmem:[%s4352_s10 + $0x2] sm:$0x2] %vm2299_vm5, %v2305_v55 }

</bundles_post_ra>
